<compile_context>
chip_gen: v7x
topology: tpu7x:2x2x1
jax: 0.10.0
libtpu: 0.0.40
codegen_flags: <defaults>
</compile_context>

<pallas_src>
import jax
import jax.numpy as jnp
from jax.experimental import pallas as pl
from jax.experimental.pallas import tpu as pltpu

# ----------------------------- config --------------------------------------
D_MODEL = 32
N_HEAD = 4
D_HEAD = D_MODEL // N_HEAD
D_FF = 64
NUM_LAYERS = 2
VOCAB = 50
LN_EPS = 1e-5
_ATTN_SCALE = 1.0 / (D_HEAD ** 0.5)
_EXACT_SOFTMAX = False   # True -> max-subtract + exact division (torch parity mode)

# ---------------- packed parameter slab layout (static constants) -----------
SLAB_COLS = 3 * D_MODEL                      # 96 = widest row (fused QKV weight/bias)
# matrix slab row offsets (all multiples of 8 -> free sublane-aligned ref slices)
_QKV_R = 0                                   # [L*D, 3D]  fused in_proj per layer
_SAWO_R = _QKV_R + NUM_LAYERS * D_MODEL      # 64   [L*D, D]   self-attn out_proj
_CAW_R = _SAWO_R + NUM_LAYERS * D_MODEL      # 128  [D, L*D]   folded cross-attn weights
_FF1_R = _CAW_R + D_MODEL                    # 160  [L*D, F]
_FF2_R = _FF1_R + NUM_LAYERS * D_MODEL       # 224  [L*F, D]
_SLAB_ROWS = _FF2_R + NUM_LAYERS * D_FF      # 352

# per-layer vector block rows inside vecs[L, 16, 96]
_VR_BQKV, _VR_SABO, _VR_CAB, _VR_BFF1, _VR_BFF2, _VR_LN = 0, 1, 2, 3, 4, 5
_VEC_ROWS = 16


# --------------------------- in-kernel helpers ------------------------------
def _layernorm(x, g, b):
    mu = jnp.mean(x, axis=-1, keepdims=True)
    var = jnp.mean(jnp.square(x - mu), axis=-1, keepdims=True)
    return (x - mu) * jax.lax.rsqrt(var + LN_EPS) * g + b


def _softmax_lastdim(sc):
    if _EXACT_SOFTMAX:
        sc = sc - jnp.max(sc, axis=-1, keepdims=True)
        p = jnp.exp(sc)
        return p / jnp.sum(p, axis=-1, keepdims=True)
    # scores are O(1) at this scale -> f32 exp cannot overflow; skip the XLU max-reduce
    p = jnp.exp(sc)
    return p * pl.reciprocal(jnp.sum(p, axis=-1, keepdims=True), approx=True)


def _self_attention(x2, n, s, w_qkv, b_qkv, w_o, b_o):
    """x2: [n*s, D] flat tokens. Multi-head self-attn, heads batched on axis 0."""
    t = n * s
    # fused QKV projection: one [T, D] @ [D, 3D] matmul
    qkv = jnp.dot(x2, w_qkv, preferred_element_type=jnp.float32) + b_qkv    # [T, 3D]

    # ONE lane->head relayout shared by Q/K/V (columns are [Qh0..Qh3|Kh0..|Vh0..]):
    qkv_b = jnp.transpose(qkv.reshape(t, 3 * N_HEAD, D_HEAD), (1, 0, 2))    # [3H, T, Dh]
    qkv_b = qkv_b.reshape(3 * N_HEAD, n, s, D_HEAD)                         # free split
    qb = qkv_b[0 * N_HEAD:1 * N_HEAD].reshape(N_HEAD * n, s, D_HEAD)
    kb = qkv_b[1 * N_HEAD:2 * N_HEAD].reshape(N_HEAD * n, s, D_HEAD)
    vb = qkv_b[2 * N_HEAD:3 * N_HEAD].reshape(N_HEAD * n, s, D_HEAD)

    # batched scores / softmax / PV over all heads at once
    sc = jnp.einsum('bqd,bkd->bqk', qb, kb,
                    preferred_element_type=jnp.float32) * _ATTN_SCALE       # [H*n, s, s]
    p = _softmax_lastdim(sc)
    ob = jnp.einsum('bqk,bkd->bqd', p, vb,
                    preferred_element_type=jnp.float32)                     # [H*n, s, Dh]

    # merge heads back with ONE relayout, then a single [T, D] @ [D, D] out-projection
    merged = jnp.transpose(ob.reshape(N_HEAD, t, D_HEAD), (1, 0, 2)).reshape(t, D_MODEL)
    return jnp.dot(merged, w_o, preferred_element_type=jnp.float32) + b_o   # [T, D]


def _decoder_layer(x2, ca, n, s, w_qkv, sa_wo, w_ff1, w_ff2, v):
    """One post-norm nn.TransformerDecoderLayer. x2: [n*s, D], ca: [n, D] (folded)."""
    t = n * s
    d = D_MODEL

    # --- self-attention block (post-norm, nn.TransformerDecoderLayer default) ---
    sa = _self_attention(x2, n, s, w_qkv, v[_VR_BQKV:_VR_BQKV + 1, :],
                         sa_wo, v[_VR_SABO:_VR_SABO + 1, 0:d])
    x2 = _layernorm(x2 + sa,
                    v[_VR_LN + 0:_VR_LN + 1, 0:d], v[_VR_LN + 1:_VR_LN + 2, 0:d])

    # --- cross-attention block: single-token memory => softmax == 1, so the block
    #     collapses to a per-batch vector precomputed BEFORE the layer loop ---
    x2 = (x2.reshape(n, s, d) + ca[:, None, :]).reshape(t, d)
    x2 = _layernorm(x2,
                    v[_VR_LN + 2:_VR_LN + 3, 0:d], v[_VR_LN + 3:_VR_LN + 4, 0:d])

    # --- feed-forward block (ReLU) ---
    hdn = jnp.maximum(
        jnp.dot(x2, w_ff1, preferred_element_type=jnp.float32)
        + v[_VR_BFF1:_VR_BFF1 + 1, 0:D_FF], 0.0)
    ff = jnp.dot(hdn, w_ff2, preferred_element_type=jnp.float32) \
        + v[_VR_BFF2:_VR_BFF2 + 1, 0:d]
    x2 = _layernorm(x2 + ff,
                    v[_VR_LN + 4:_VR_LN + 5, 0:d], v[_VR_LN + 5:_VR_LN + 6, 0:d])
    return x2


# ----------------------- fused forward-pass kernel --------------------------
def _captioning_kernel(x_flat_ref, x_in_ref, enc_wt_ref, w_ref, vec_ref, o_ref):
    n, s, d = x_in_ref.shape
    t = n * s

    # image encoder: enc_w stored transposed / lane-dense [D, C*H*W]; the 'nk,dk->nd'
    # contraction is the standard attention-scores pattern (no explicit transpose).
    mem = jnp.einsum('nk,dk->nd', x_flat_ref[...], enc_wt_ref[...],
                     preferred_element_type=jnp.float32)                    # [n, D]

    # folded cross-attention for BOTH layers in one matmul (depends only on mem)
    ca_all = jnp.dot(mem, w_ref[_CAW_R:_CAW_R + d, 0:NUM_LAYERS * d],
                     preferred_element_type=jnp.float32)                    # [n, L*D]

    # token embedding + sinusoidal PE was folded in the wrapper; flatten to [T, D]
    x2 = x_in_ref[...].reshape(t, d)

    for l in range(NUM_LAYERS):   # static unroll; activations stay resident in VMEM
        v = vec_ref[l]                                                       # [16, 96]
        w_qkv = w_ref[_QKV_R + l * d:_QKV_R + (l + 1) * d, 0:3 * d]
        sa_wo = w_ref[_SAWO_R + l * d:_SAWO_R + (l + 1) * d, 0:d]
        w_ff1 = w_ref[_FF1_R + l * d:_FF1_R + (l + 1) * d, 0:D_FF]
        w_ff2 = w_ref[_FF2_R + l * D_FF:_FF2_R + (l + 1) * D_FF, 0:d]
        ca_l = ca_all[:, l * d:(l + 1) * d] + v[_VR_CAB:_VR_CAB + 1, 0:d]    # [n, D]
        x2 = _decoder_layer(x2, ca_l, n, s, w_qkv, sa_wo, w_ff1, w_ff2, v)

    # plain [T, D] store; the wrapper does the cheap reshape/transpose to [S, N, D]
    o_ref[...] = x2


# ------------------------------ glue (plain JAX) ---------------------------
def sinusoidal_pe(s, d):
    i = jnp.arange(s, dtype=jnp.float32)[:, None]
    exponents = jnp.power(10000.0, -jnp.arange(0, d, 2, dtype=jnp.float32) / d)
    pe = jnp.zeros((s, d), jnp.float32)
    pe = pe.at[:, 0::2].set(jnp.sin(i * exponents))
    pe = pe.at[:, 1::2].set(jnp.cos(i * exponents))
    return pe


def init_params(key, c, h, w):
    L, D, F = NUM_LAYERS, D_MODEL, D_FF
    keys = iter(jax.random.split(key, 10))

    def nrm(shape, scale=0.02):
        return (scale * jax.random.normal(next(keys), shape)).astype(jnp.float32)

    enc_w = nrm((c * h * w, D))                 # image-encoder projection (logical)
    enc_b = jnp.zeros((D,), jnp.float32)
    embedding = nrm((VOCAB, D), scale=1.0)

    w_qkv = nrm((L, D, 3 * D))                  # fused in_proj; cols = [Q | K | V], head-contig
    sa_wo = nrm((L, D, D))                      # self-attn out_proj
    ca_wv = nrm((L, D, D))                      # cross-attn V proj
    ca_wo = nrm((L, D, D))                      # cross-attn out_proj
    w_ff1 = nrm((L, D, F))
    w_ff2 = nrm((L, F, D))
    ca_bv = jnp.zeros((L, D), jnp.float32)
    ca_bo = jnp.zeros((L, D), jnp.float32)
    # (all other biases zero, LN gamma = 1 / beta = 0 -> zero rows in the vector slab)

    # --- algebraic folds: single memory token => cross-attn collapses to ---
    #     ca_l(x_img) = (x_img @ enc_w) @ (Wv_l @ Wo_l) + enc_b @ Wv_l @ Wo_l
    #                   + bv_l @ Wo_l + bo_l
    # NOTE: cross-attn Q/K projections are mathematically dead (softmax over 1 key == 1).
    ca_w = jnp.einsum('lij,ljk->lik', ca_wv, ca_wo)                         # [L, D, D]
    ca_b = (jnp.einsum('d,ldk->lk', enc_b, ca_w)
            + jnp.einsum('ld,ldk->lk', ca_bv, ca_wo) + ca_bo)               # [L, D]
    ca_w_all = jnp.transpose(ca_w, (1, 0, 2)).reshape(D, L * D)             # [D, L*D]

    # --- pack every matrix into ONE [352, 96] slab (sublane-aligned row blocks) ---
    def pad_cols(m):
        return jnp.pad(m, ((0, 0), (0, SLAB_COLS - m.shape[1])))

    w_slab = jnp.concatenate([
        pad_cols(w_qkv.reshape(L * D, 3 * D)),     # rows [_QKV_R  : 64)
        pad_cols(sa_wo.reshape(L * D, D)),         # rows [_SAWO_R : 128)
        pad_cols(ca_w_all),                        # rows [_CAW_R  : 160)
        pad_cols(w_ff1.reshape(L * D, F)),         # rows [_FF1_R  : 224)
        pad_cols(w_ff2.reshape(L * F, D)),         # rows [_FF2_R  : 352)
    ], axis=0)
    assert w_slab.shape == (_SLAB_ROWS, SLAB_COLS), w_slab.shape

    # --- pack all bias / LayerNorm vectors into ONE [L, 16, 96] slab ---
    vecs = jnp.zeros((L, _VEC_ROWS, SLAB_COLS), jnp.float32)
    vecs = vecs.at[:, _VR_CAB, :D].set(ca_b)
    vecs = vecs.at[:, _VR_LN + 0, :D].set(1.0)     # LN1 gamma
    vecs = vecs.at[:, _VR_LN + 2, :D].set(1.0)     # LN2 gamma
    vecs = vecs.at[:, _VR_LN + 4, :D].set(1.0)     # LN3 gamma

    return {
        'embedding': embedding,
        'enc_w_t': enc_w.T,      # [D, C*H*W] lane-dense (avoids 4x padded DMA)
        'w_slab': w_slab,
        'vecs': vecs,
    }


def image_captioning_forward(image, caption, params):
    """image: [N, C, H, W] f32, caption: [N, S] int32 -> [S, N, D_MODEL] f32."""
    n = image.shape[0]
    s = caption.shape[1]
    x_flat = image.reshape(n, -1).astype(jnp.float32)                 # [N, C*H*W]
    # embedding gather + positional encoding folded in XLA (one fewer kernel input)
    x_in = params['embedding'][caption] + sinusoidal_pe(s, D_MODEL)[None, :, :]

    args = (x_flat, x_in, params['enc_w_t'], params['w_slab'], params['vecs'])
    out_flat = pl.pallas_call(
        _captioning_kernel,
        out_shape=jax.ShapeDtypeStruct((n * s, D_MODEL), jnp.float32),
        in_specs=[pl.BlockSpec(memory_space=pltpu.MemorySpace.VMEM)] * len(args),
        out_specs=pl.BlockSpec(memory_space=pltpu.MemorySpace.VMEM),
    )(*args)

    # [T, D] -> [N, S, D] -> seq-first [S, N, D] (nn.TransformerDecoder, batch_first=False)
    return jnp.transpose(out_flat.reshape(n, s, D_MODEL), (1, 0, 2))


# --------------------------------- main -------------------------------------
if __name__ == "__main__":
    key = jax.random.PRNGKey(0)
    k_img, k_cap, k_par = jax.random.split(key, 3)

    image = jax.random.normal(k_img, (2, 4, 16, 16), dtype=jnp.float32)
    caption = jax.random.randint(k_cap, (2, 8), 0, VOCAB, dtype=jnp.int32)
    params = init_params(k_par, c=4, h=16, w=16)

    out = jax.jit(image_captioning_forward)(image, caption, params)
    out = jax.block_until_ready(out)

    assert out.shape == (8, 2, D_MODEL), out.shape
    assert bool(jnp.all(jnp.isfinite(out)))
    print("KERNEL_OK")
</pallas_src>

<mosaic_0001>
module attributes {stable_mosaic.version = 11 : i64} {
  func.func @_captioning_kernel(%arg0: memref<2x1024xf32, #tpu.memory_space<vmem>>, %arg1: memref<2x8x32xf32, #tpu.memory_space<vmem>>, %arg2: memref<32x1024xf32, #tpu.memory_space<vmem>>, %arg3: memref<352x96xf32, #tpu.memory_space<vmem>>, %arg4: memref<2x16x96xf32, #tpu.memory_space<vmem>>, %arg5: memref<16x32xf32, #tpu.memory_space<vmem>>) attributes {dimension_semantics = [], scalar_prefetch = 0 : i64, scratch_operands = 0 : i64, tpu.core_type = #tpu.core_type<tc>} {
    %c0 = arith.constant 0 : index
    %c0_0 = arith.constant 0 : index
    %0 = vector.load %arg0[%c0, %c0_0] : memref<2x1024xf32, #tpu.memory_space<vmem>>, vector<2x1024xf32>
    %c0_1 = arith.constant 0 : index
    %c0_2 = arith.constant 0 : index
    %1 = vector.load %arg2[%c0_1, %c0_2] : memref<32x1024xf32, #tpu.memory_space<vmem>>, vector<32x1024xf32>
    "tpu.trace_start"() <{level = 10 : i32, message = "nk,dk->nd"}> : () -> ()
    %cst = arith.constant dense<0.000000e+00> : vector<2x32xf32>
    %2 = tpu.matmul %0, %1, %cst {dimension_numbers = #tpu.dot_dimension_numbers<[1], [1], [0], [0], [0, 0, 1, 0], [], []>} : vector<2x1024xf32>, vector<32x1024xf32>, vector<2x32xf32> -> vector<2x32xf32>
    "tpu.trace_stop"() : () -> ()
    %c128 = arith.constant 128 : index
    %c0_3 = arith.constant 0 : index
    %3 = vector.load %arg3[%c128, %c0_3] : memref<352x96xf32, #tpu.memory_space<vmem>>, vector<32x64xf32>
    %cst_4 = arith.constant dense<0.000000e+00> : vector<2x64xf32>
    %4 = tpu.matmul %2, %3, %cst_4 {dimension_numbers = #tpu.dot_dimension_numbers<[1], [0], [0], [1], [0, 0, 1, 1], [], []>} : vector<2x32xf32>, vector<32x64xf32>, vector<2x64xf32> -> vector<2x64xf32>
    %c0_5 = arith.constant 0 : index
    %c0_6 = arith.constant 0 : index
    %c0_7 = arith.constant 0 : index
    %5 = vector.load %arg1[%c0_5, %c0_6, %c0_7] : memref<2x8x32xf32, #tpu.memory_space<vmem>>, vector<2x8x32xf32>
    %6 = vector.shape_cast %5 : vector<2x8x32xf32> to vector<16x32xf32>
    %c0_8 = arith.constant 0 : index
    %c0_9 = arith.constant 0 : index
    %c0_10 = arith.constant 0 : index
    %7 = vector.load %arg4[%c0_8, %c0_9, %c0_10] : memref<2x16x96xf32, #tpu.memory_space<vmem>>, vector<1x16x96xf32>
    %8 = vector.shape_cast %7 : vector<1x16x96xf32> to vector<16x96xf32>
    %c0_11 = arith.constant 0 : index
    %c0_12 = arith.constant 0 : index
    %9 = vector.load %arg3[%c0_11, %c0_12] : memref<352x96xf32, #tpu.memory_space<vmem>>, vector<32x96xf32>
    %c64 = arith.constant 64 : index
    %c0_13 = arith.constant 0 : index
    %10 = vector.load %arg3[%c64, %c0_13] : memref<352x96xf32, #tpu.memory_space<vmem>>, vector<32x32xf32>
    %c160 = arith.constant 160 : index
    %c0_14 = arith.constant 0 : index
    %11 = vector.load %arg3[%c160, %c0_14] : memref<352x96xf32, #tpu.memory_space<vmem>>, vector<32x64xf32>
    %c224 = arith.constant 224 : index
    %c0_15 = arith.constant 0 : index
    %12 = vector.load %arg3[%c224, %c0_15] : memref<352x96xf32, #tpu.memory_space<vmem>>, vector<64x32xf32>
    %13 = vector.extract_strided_slice %4 {offsets = [0, 0], sizes = [2, 32], strides = [1, 1]} : vector<2x64xf32> to vector<2x32xf32>
    %14 = vector.extract_strided_slice %8 {offsets = [2, 0], sizes = [1, 32], strides = [1, 1]} : vector<16x96xf32> to vector<1x32xf32>
    %15 = vector.broadcast %14 : vector<1x32xf32> to vector<2x32xf32>
    %16 = arith.addf %13, %15 : vector<2x32xf32>
    %17 = vector.extract_strided_slice %8 {offsets = [0, 0], sizes = [1, 96], strides = [1, 1]} : vector<16x96xf32> to vector<1x96xf32>
    %18 = vector.extract_strided_slice %8 {offsets = [1, 0], sizes = [1, 32], strides = [1, 1]} : vector<16x96xf32> to vector<1x32xf32>
    %cst_16 = arith.constant dense<0.000000e+00> : vector<16x96xf32>
    %19 = tpu.matmul %6, %9, %cst_16 {dimension_numbers = #tpu.dot_dimension_numbers<[1], [0], [0], [1], [0, 0, 1, 1], [], []>} : vector<16x32xf32>, vector<32x96xf32>, vector<16x96xf32> -> vector<16x96xf32>
    %20 = vector.broadcast %17 : vector<1x96xf32> to vector<16x96xf32>
    %21 = arith.addf %19, %20 : vector<16x96xf32>
    %22 = vector.shape_cast %21 : vector<16x96xf32> to vector<16x12x8xf32>
    %23 = tpu.transpose %22, [1, 0, 2] : vector<16x12x8xf32> -> vector<12x16x8xf32>
    %24 = vector.shape_cast %23 : vector<12x16x8xf32> to vector<12x2x8x8xf32>
    %25 = vector.extract_strided_slice %24 {offsets = [0, 0, 0, 0], sizes = [4, 2, 8, 8], strides = [1, 1, 1, 1]} : vector<12x2x8x8xf32> to vector<4x2x8x8xf32>
    %26 = vector.shape_cast %25 : vector<4x2x8x8xf32> to vector<8x8x8xf32>
    %27 = vector.extract_strided_slice %24 {offsets = [4, 0, 0, 0], sizes = [4, 2, 8, 8], strides = [1, 1, 1, 1]} : vector<12x2x8x8xf32> to vector<4x2x8x8xf32>
    %28 = vector.shape_cast %27 : vector<4x2x8x8xf32> to vector<8x8x8xf32>
    %29 = vector.extract_strided_slice %24 {offsets = [8, 0, 0, 0], sizes = [4, 2, 8, 8], strides = [1, 1, 1, 1]} : vector<12x2x8x8xf32> to vector<4x2x8x8xf32>
    %30 = vector.shape_cast %29 : vector<4x2x8x8xf32> to vector<8x8x8xf32>
    "tpu.trace_start"() <{level = 10 : i32, message = "bqd,bkd->bqk"}> : () -> ()
    %cst_17 = arith.constant dense<0.000000e+00> : vector<8x8x8xf32>
    %31 = tpu.matmul %26, %28, %cst_17 {dimension_numbers = #tpu.dot_dimension_numbers<[2], [2], [1], [1], [0, 0, 0, 1, 1, 1], [0], [0]>} : vector<8x8x8xf32>, vector<8x8x8xf32>, vector<8x8x8xf32> -> vector<8x8x8xf32>
    "tpu.trace_stop"() : () -> ()
    %cst_18 = arith.constant 0.353553385 : f32
    %32 = vector.broadcast %cst_18 : f32 to vector<8x8x8xf32>
    %33 = arith.mulf %31, %32 : vector<8x8x8xf32>
    %34 = math.exp %33 : vector<8x8x8xf32>
    %cst_19 = arith.constant dense<0.000000e+00> : vector<8x8xf32>
    %35 = vector.multi_reduction <add>, %34, %cst_19 [2] : vector<8x8x8xf32> to vector<8x8xf32>
    %36 = vector.shape_cast %35 : vector<8x8xf32> to vector<8x8x1xf32>
    %37 = tpu.reciprocal %36 {approx = true} : vector<8x8x1xf32> -> vector<8x8x1xf32>
    %38 = vector.broadcast %37 : vector<8x8x1xf32> to vector<8x8x8xf32>
    %39 = arith.mulf %34, %38 : vector<8x8x8xf32>
    "tpu.trace_start"() <{level = 10 : i32, message = "bqk,bkd->bqd"}> : () -> ()
    %cst_20 = arith.constant dense<0.000000e+00> : vector<8x8x8xf32>
    %40 = tpu.matmul %39, %30, %cst_20 {dimension_numbers = #tpu.dot_dimension_numbers<[2], [1], [1], [2], [0, 0, 0, 1, 1, 2], [0], [0]>} : vector<8x8x8xf32>, vector<8x8x8xf32>, vector<8x8x8xf32> -> vector<8x8x8xf32>
    "tpu.trace_stop"() : () -> ()
    %41 = vector.shape_cast %40 : vector<8x8x8xf32> to vector<4x16x8xf32>
    %42 = tpu.transpose %41, [1, 0, 2] : vector<4x16x8xf32> -> vector<16x4x8xf32>
    %43 = vector.shape_cast %42 : vector<16x4x8xf32> to vector<16x32xf32>
    %cst_21 = arith.constant dense<0.000000e+00> : vector<16x32xf32>
    %44 = tpu.matmul %43, %10, %cst_21 {dimension_numbers = #tpu.dot_dimension_numbers<[1], [0], [0], [1], [0, 0, 1, 1], [], []>} : vector<16x32xf32>, vector<32x32xf32>, vector<16x32xf32> -> vector<16x32xf32>
    %45 = vector.broadcast %18 : vector<1x32xf32> to vector<16x32xf32>
    %46 = arith.addf %44, %45 : vector<16x32xf32>
    %47 = arith.addf %6, %46 : vector<16x32xf32>
    %48 = vector.extract_strided_slice %8 {offsets = [5, 0], sizes = [1, 32], strides = [1, 1]} : vector<16x96xf32> to vector<1x32xf32>
    %49 = vector.extract_strided_slice %8 {offsets = [6, 0], sizes = [1, 32], strides = [1, 1]} : vector<16x96xf32> to vector<1x32xf32>
    %cst_22 = arith.constant dense<0.000000e+00> : vector<16xf32>
    %50 = vector.multi_reduction <add>, %47, %cst_22 [1] : vector<16x32xf32> to vector<16xf32>
    %51 = vector.shape_cast %50 : vector<16xf32> to vector<16x1xf32>
    %cst_23 = arith.constant 3.200000e+01 : f32
    %52 = vector.broadcast %cst_23 : f32 to vector<16x1xf32>
    %53 = arith.divf %51, %52 : vector<16x1xf32>
    %54 = vector.broadcast %53 : vector<16x1xf32> to vector<16x32xf32>
    %55 = arith.subf %47, %54 : vector<16x32xf32>
    %56 = arith.mulf %55, %55 : vector<16x32xf32>
    %cst_24 = arith.constant dense<0.000000e+00> : vector<16xf32>
    %57 = vector.multi_reduction <add>, %56, %cst_24 [1] : vector<16x32xf32> to vector<16xf32>
    %58 = vector.shape_cast %57 : vector<16xf32> to vector<16x1xf32>
    %cst_25 = arith.constant 3.200000e+01 : f32
    %59 = vector.broadcast %cst_25 : f32 to vector<16x1xf32>
    %60 = arith.divf %58, %59 : vector<16x1xf32>
    %61 = vector.broadcast %53 : vector<16x1xf32> to vector<16x32xf32>
    %62 = arith.subf %47, %61 : vector<16x32xf32>
    %cst_26 = arith.constant 9.99999974E-6 : f32
    %63 = vector.broadcast %cst_26 : f32 to vector<16x1xf32>
    %64 = arith.addf %60, %63 : vector<16x1xf32>
    %65 = math.rsqrt %64 : vector<16x1xf32>
    %66 = vector.broadcast %65 : vector<16x1xf32> to vector<16x32xf32>
    %67 = arith.mulf %62, %66 : vector<16x32xf32>
    %68 = vector.broadcast %48 : vector<1x32xf32> to vector<16x32xf32>
    %69 = arith.mulf %67, %68 : vector<16x32xf32>
    %70 = vector.broadcast %49 : vector<1x32xf32> to vector<16x32xf32>
    %71 = arith.addf %69, %70 : vector<16x32xf32>
    %72 = vector.shape_cast %71 : vector<16x32xf32> to vector<2x8x32xf32>
    %73 = vector.shape_cast %16 : vector<2x32xf32> to vector<2x1x32xf32>
    %74 = vector.broadcast %73 : vector<2x1x32xf32> to vector<2x8x32xf32>
    %75 = arith.addf %72, %74 : vector<2x8x32xf32>
    %76 = vector.shape_cast %75 : vector<2x8x32xf32> to vector<16x32xf32>
    %77 = vector.extract_strided_slice %8 {offsets = [7, 0], sizes = [1, 32], strides = [1, 1]} : vector<16x96xf32> to vector<1x32xf32>
    %78 = vector.extract_strided_slice %8 {offsets = [8, 0], sizes = [1, 32], strides = [1, 1]} : vector<16x96xf32> to vector<1x32xf32>
    %cst_27 = arith.constant dense<0.000000e+00> : vector<16xf32>
    %79 = vector.multi_reduction <add>, %76, %cst_27 [1] : vector<16x32xf32> to vector<16xf32>
    %80 = vector.shape_cast %79 : vector<16xf32> to vector<16x1xf32>
    %cst_28 = arith.constant 3.200000e+01 : f32
    %81 = vector.broadcast %cst_28 : f32 to vector<16x1xf32>
    %82 = arith.divf %80, %81 : vector<16x1xf32>
    %83 = vector.broadcast %82 : vector<16x1xf32> to vector<16x32xf32>
    %84 = arith.subf %76, %83 : vector<16x32xf32>
    %85 = arith.mulf %84, %84 : vector<16x32xf32>
    %cst_29 = arith.constant dense<0.000000e+00> : vector<16xf32>
    %86 = vector.multi_reduction <add>, %85, %cst_29 [1] : vector<16x32xf32> to vector<16xf32>
    %87 = vector.shape_cast %86 : vector<16xf32> to vector<16x1xf32>
    %cst_30 = arith.constant 3.200000e+01 : f32
    %88 = vector.broadcast %cst_30 : f32 to vector<16x1xf32>
    %89 = arith.divf %87, %88 : vector<16x1xf32>
    %90 = vector.broadcast %82 : vector<16x1xf32> to vector<16x32xf32>
    %91 = arith.subf %76, %90 : vector<16x32xf32>
    %cst_31 = arith.constant 9.99999974E-6 : f32
    %92 = vector.broadcast %cst_31 : f32 to vector<16x1xf32>
    %93 = arith.addf %89, %92 : vector<16x1xf32>
    %94 = math.rsqrt %93 : vector<16x1xf32>
    %95 = vector.broadcast %94 : vector<16x1xf32> to vector<16x32xf32>
    %96 = arith.mulf %91, %95 : vector<16x32xf32>
    %97 = vector.broadcast %77 : vector<1x32xf32> to vector<16x32xf32>
    %98 = arith.mulf %96, %97 : vector<16x32xf32>
    %99 = vector.broadcast %78 : vector<1x32xf32> to vector<16x32xf32>
    %100 = arith.addf %98, %99 : vector<16x32xf32>
    %cst_32 = arith.constant dense<0.000000e+00> : vector<16x64xf32>
    %101 = tpu.matmul %100, %11, %cst_32 {dimension_numbers = #tpu.dot_dimension_numbers<[1], [0], [0], [1], [0, 0, 1, 1], [], []>} : vector<16x32xf32>, vector<32x64xf32>, vector<16x64xf32> -> vector<16x64xf32>
    %102 = vector.extract_strided_slice %8 {offsets = [3, 0], sizes = [1, 64], strides = [1, 1]} : vector<16x96xf32> to vector<1x64xf32>
    %103 = vector.broadcast %102 : vector<1x64xf32> to vector<16x64xf32>
    %104 = arith.addf %101, %103 : vector<16x64xf32>
    %cst_33 = arith.constant 0.000000e+00 : f32
    %105 = vector.broadcast %cst_33 : f32 to vector<16x64xf32>
    %106 = arith.maximumf %104, %105 : vector<16x64xf32>
    %cst_34 = arith.constant dense<0.000000e+00> : vector<16x32xf32>
    %107 = tpu.matmul %106, %12, %cst_34 {dimension_numbers = #tpu.dot_dimension_numbers<[1], [0], [0], [1], [0, 0, 1, 1], [], []>} : vector<16x64xf32>, vector<64x32xf32>, vector<16x32xf32> -> vector<16x32xf32>
    %108 = vector.extract_strided_slice %8 {offsets = [4, 0], sizes = [1, 32], strides = [1, 1]} : vector<16x96xf32> to vector<1x32xf32>
    %109 = vector.broadcast %108 : vector<1x32xf32> to vector<16x32xf32>
    %110 = arith.addf %107, %109 : vector<16x32xf32>
    %111 = arith.addf %100, %110 : vector<16x32xf32>
    %112 = vector.extract_strided_slice %8 {offsets = [9, 0], sizes = [1, 32], strides = [1, 1]} : vector<16x96xf32> to vector<1x32xf32>
    %113 = vector.extract_strided_slice %8 {offsets = [10, 0], sizes = [1, 32], strides = [1, 1]} : vector<16x96xf32> to vector<1x32xf32>
    %cst_35 = arith.constant dense<0.000000e+00> : vector<16xf32>
    %114 = vector.multi_reduction <add>, %111, %cst_35 [1] : vector<16x32xf32> to vector<16xf32>
    %115 = vector.shape_cast %114 : vector<16xf32> to vector<16x1xf32>
    %cst_36 = arith.constant 3.200000e+01 : f32
    %116 = vector.broadcast %cst_36 : f32 to vector<16x1xf32>
    %117 = arith.divf %115, %116 : vector<16x1xf32>
    %118 = vector.broadcast %117 : vector<16x1xf32> to vector<16x32xf32>
    %119 = arith.subf %111, %118 : vector<16x32xf32>
    %120 = arith.mulf %119, %119 : vector<16x32xf32>
    %cst_37 = arith.constant dense<0.000000e+00> : vector<16xf32>
    %121 = vector.multi_reduction <add>, %120, %cst_37 [1] : vector<16x32xf32> to vector<16xf32>
    %122 = vector.shape_cast %121 : vector<16xf32> to vector<16x1xf32>
    %cst_38 = arith.constant 3.200000e+01 : f32
    %123 = vector.broadcast %cst_38 : f32 to vector<16x1xf32>
    %124 = arith.divf %122, %123 : vector<16x1xf32>
    %125 = vector.broadcast %117 : vector<16x1xf32> to vector<16x32xf32>
    %126 = arith.subf %111, %125 : vector<16x32xf32>
    %cst_39 = arith.constant 9.99999974E-6 : f32
    %127 = vector.broadcast %cst_39 : f32 to vector<16x1xf32>
    %128 = arith.addf %124, %127 : vector<16x1xf32>
    %129 = math.rsqrt %128 : vector<16x1xf32>
    %130 = vector.broadcast %129 : vector<16x1xf32> to vector<16x32xf32>
    %131 = arith.mulf %126, %130 : vector<16x32xf32>
    %132 = vector.broadcast %112 : vector<1x32xf32> to vector<16x32xf32>
    %133 = arith.mulf %131, %132 : vector<16x32xf32>
    %134 = vector.broadcast %113 : vector<1x32xf32> to vector<16x32xf32>
    %135 = arith.addf %133, %134 : vector<16x32xf32>
    %c1 = arith.constant 1 : index
    %c0_40 = arith.constant 0 : index
    %c0_41 = arith.constant 0 : index
    %136 = vector.load %arg4[%c1, %c0_40, %c0_41] : memref<2x16x96xf32, #tpu.memory_space<vmem>>, vector<1x16x96xf32>
    %137 = vector.shape_cast %136 : vector<1x16x96xf32> to vector<16x96xf32>
    %c32 = arith.constant 32 : index
    %c0_42 = arith.constant 0 : index
    %138 = vector.load %arg3[%c32, %c0_42] : memref<352x96xf32, #tpu.memory_space<vmem>>, vector<32x96xf32>
    %c96 = arith.constant 96 : index
    %c0_43 = arith.constant 0 : index
    %139 = vector.load %arg3[%c96, %c0_43] : memref<352x96xf32, #tpu.memory_space<vmem>>, vector<32x32xf32>
    %c192 = arith.constant 192 : index
    %c0_44 = arith.constant 0 : index
    %140 = vector.load %arg3[%c192, %c0_44] : memref<352x96xf32, #tpu.memory_space<vmem>>, vector<32x64xf32>
    %c288 = arith.constant 288 : index
    %c0_45 = arith.constant 0 : index
    %141 = vector.load %arg3[%c288, %c0_45] : memref<352x96xf32, #tpu.memory_space<vmem>>, vector<64x32xf32>
    %142 = vector.extract_strided_slice %4 {offsets = [0, 32], sizes = [2, 32], strides = [1, 1]} : vector<2x64xf32> to vector<2x32xf32>
    %143 = vector.extract_strided_slice %137 {offsets = [2, 0], sizes = [1, 32], strides = [1, 1]} : vector<16x96xf32> to vector<1x32xf32>
    %144 = vector.broadcast %143 : vector<1x32xf32> to vector<2x32xf32>
    %145 = arith.addf %142, %144 : vector<2x32xf32>
    %146 = vector.extract_strided_slice %137 {offsets = [0, 0], sizes = [1, 96], strides = [1, 1]} : vector<16x96xf32> to vector<1x96xf32>
    %147 = vector.extract_strided_slice %137 {offsets = [1, 0], sizes = [1, 32], strides = [1, 1]} : vector<16x96xf32> to vector<1x32xf32>
    %cst_46 = arith.constant dense<0.000000e+00> : vector<16x96xf32>
    %148 = tpu.matmul %135, %138, %cst_46 {dimension_numbers = #tpu.dot_dimension_numbers<[1], [0], [0], [1], [0, 0, 1, 1], [], []>} : vector<16x32xf32>, vector<32x96xf32>, vector<16x96xf32> -> vector<16x96xf32>
    %149 = vector.broadcast %146 : vector<1x96xf32> to vector<16x96xf32>
    %150 = arith.addf %148, %149 : vector<16x96xf32>
    %151 = vector.shape_cast %150 : vector<16x96xf32> to vector<16x12x8xf32>
    %152 = tpu.transpose %151, [1, 0, 2] : vector<16x12x8xf32> -> vector<12x16x8xf32>
    %153 = vector.shape_cast %152 : vector<12x16x8xf32> to vector<12x2x8x8xf32>
    %154 = vector.extract_strided_slice %153 {offsets = [0, 0, 0, 0], sizes = [4, 2, 8, 8], strides = [1, 1, 1, 1]} : vector<12x2x8x8xf32> to vector<4x2x8x8xf32>
    %155 = vector.shape_cast %154 : vector<4x2x8x8xf32> to vector<8x8x8xf32>
    %156 = vector.extract_strided_slice %153 {offsets = [4, 0, 0, 0], sizes = [4, 2, 8, 8], strides = [1, 1, 1, 1]} : vector<12x2x8x8xf32> to vector<4x2x8x8xf32>
    %157 = vector.shape_cast %156 : vector<4x2x8x8xf32> to vector<8x8x8xf32>
    %158 = vector.extract_strided_slice %153 {offsets = [8, 0, 0, 0], sizes = [4, 2, 8, 8], strides = [1, 1, 1, 1]} : vector<12x2x8x8xf32> to vector<4x2x8x8xf32>
    %159 = vector.shape_cast %158 : vector<4x2x8x8xf32> to vector<8x8x8xf32>
    "tpu.trace_start"() <{level = 10 : i32, message = "bqd,bkd->bqk"}> : () -> ()
    %cst_47 = arith.constant dense<0.000000e+00> : vector<8x8x8xf32>
    %160 = tpu.matmul %155, %157, %cst_47 {dimension_numbers = #tpu.dot_dimension_numbers<[2], [2], [1], [1], [0, 0, 0, 1, 1, 1], [0], [0]>} : vector<8x8x8xf32>, vector<8x8x8xf32>, vector<8x8x8xf32> -> vector<8x8x8xf32>
    "tpu.trace_stop"() : () -> ()
    %cst_48 = arith.constant 0.353553385 : f32
    %161 = vector.broadcast %cst_48 : f32 to vector<8x8x8xf32>
    %162 = arith.mulf %160, %161 : vector<8x8x8xf32>
    %163 = math.exp %162 : vector<8x8x8xf32>
    %cst_49 = arith.constant dense<0.000000e+00> : vector<8x8xf32>
    %164 = vector.multi_reduction <add>, %163, %cst_49 [2] : vector<8x8x8xf32> to vector<8x8xf32>
    %165 = vector.shape_cast %164 : vector<8x8xf32> to vector<8x8x1xf32>
    %166 = tpu.reciprocal %165 {approx = true} : vector<8x8x1xf32> -> vector<8x8x1xf32>
    %167 = vector.broadcast %166 : vector<8x8x1xf32> to vector<8x8x8xf32>
    %168 = arith.mulf %163, %167 : vector<8x8x8xf32>
    "tpu.trace_start"() <{level = 10 : i32, message = "bqk,bkd->bqd"}> : () -> ()
    %cst_50 = arith.constant dense<0.000000e+00> : vector<8x8x8xf32>
    %169 = tpu.matmul %168, %159, %cst_50 {dimension_numbers = #tpu.dot_dimension_numbers<[2], [1], [1], [2], [0, 0, 0, 1, 1, 2], [0], [0]>} : vector<8x8x8xf32>, vector<8x8x8xf32>, vector<8x8x8xf32> -> vector<8x8x8xf32>
    "tpu.trace_stop"() : () -> ()
    %170 = vector.shape_cast %169 : vector<8x8x8xf32> to vector<4x16x8xf32>
    %171 = tpu.transpose %170, [1, 0, 2] : vector<4x16x8xf32> -> vector<16x4x8xf32>
    %172 = vector.shape_cast %171 : vector<16x4x8xf32> to vector<16x32xf32>
    %cst_51 = arith.constant dense<0.000000e+00> : vector<16x32xf32>
    %173 = tpu.matmul %172, %139, %cst_51 {dimension_numbers = #tpu.dot_dimension_numbers<[1], [0], [0], [1], [0, 0, 1, 1], [], []>} : vector<16x32xf32>, vector<32x32xf32>, vector<16x32xf32> -> vector<16x32xf32>
    %174 = vector.broadcast %147 : vector<1x32xf32> to vector<16x32xf32>
    %175 = arith.addf %173, %174 : vector<16x32xf32>
    %176 = arith.addf %135, %175 : vector<16x32xf32>
    %177 = vector.extract_strided_slice %137 {offsets = [5, 0], sizes = [1, 32], strides = [1, 1]} : vector<16x96xf32> to vector<1x32xf32>
    %178 = vector.extract_strided_slice %137 {offsets = [6, 0], sizes = [1, 32], strides = [1, 1]} : vector<16x96xf32> to vector<1x32xf32>
    %cst_52 = arith.constant dense<0.000000e+00> : vector<16xf32>
    %179 = vector.multi_reduction <add>, %176, %cst_52 [1] : vector<16x32xf32> to vector<16xf32>
    %180 = vector.shape_cast %179 : vector<16xf32> to vector<16x1xf32>
    %cst_53 = arith.constant 3.200000e+01 : f32
    %181 = vector.broadcast %cst_53 : f32 to vector<16x1xf32>
    %182 = arith.divf %180, %181 : vector<16x1xf32>
    %183 = vector.broadcast %182 : vector<16x1xf32> to vector<16x32xf32>
    %184 = arith.subf %176, %183 : vector<16x32xf32>
    %185 = arith.mulf %184, %184 : vector<16x32xf32>
    %cst_54 = arith.constant dense<0.000000e+00> : vector<16xf32>
    %186 = vector.multi_reduction <add>, %185, %cst_54 [1] : vector<16x32xf32> to vector<16xf32>
    %187 = vector.shape_cast %186 : vector<16xf32> to vector<16x1xf32>
    %cst_55 = arith.constant 3.200000e+01 : f32
    %188 = vector.broadcast %cst_55 : f32 to vector<16x1xf32>
    %189 = arith.divf %187, %188 : vector<16x1xf32>
    %190 = vector.broadcast %182 : vector<16x1xf32> to vector<16x32xf32>
    %191 = arith.subf %176, %190 : vector<16x32xf32>
    %cst_56 = arith.constant 9.99999974E-6 : f32
    %192 = vector.broadcast %cst_56 : f32 to vector<16x1xf32>
    %193 = arith.addf %189, %192 : vector<16x1xf32>
    %194 = math.rsqrt %193 : vector<16x1xf32>
    %195 = vector.broadcast %194 : vector<16x1xf32> to vector<16x32xf32>
    %196 = arith.mulf %191, %195 : vector<16x32xf32>
    %197 = vector.broadcast %177 : vector<1x32xf32> to vector<16x32xf32>
    %198 = arith.mulf %196, %197 : vector<16x32xf32>
    %199 = vector.broadcast %178 : vector<1x32xf32> to vector<16x32xf32>
    %200 = arith.addf %198, %199 : vector<16x32xf32>
    %201 = vector.shape_cast %200 : vector<16x32xf32> to vector<2x8x32xf32>
    %202 = vector.shape_cast %145 : vector<2x32xf32> to vector<2x1x32xf32>
    %203 = vector.broadcast %202 : vector<2x1x32xf32> to vector<2x8x32xf32>
    %204 = arith.addf %201, %203 : vector<2x8x32xf32>
    %205 = vector.shape_cast %204 : vector<2x8x32xf32> to vector<16x32xf32>
    %206 = vector.extract_strided_slice %137 {offsets = [7, 0], sizes = [1, 32], strides = [1, 1]} : vector<16x96xf32> to vector<1x32xf32>
    %207 = vector.extract_strided_slice %137 {offsets = [8, 0], sizes = [1, 32], strides = [1, 1]} : vector<16x96xf32> to vector<1x32xf32>
    %cst_57 = arith.constant dense<0.000000e+00> : vector<16xf32>
    %208 = vector.multi_reduction <add>, %205, %cst_57 [1] : vector<16x32xf32> to vector<16xf32>
    %209 = vector.shape_cast %208 : vector<16xf32> to vector<16x1xf32>
    %cst_58 = arith.constant 3.200000e+01 : f32
    %210 = vector.broadcast %cst_58 : f32 to vector<16x1xf32>
    %211 = arith.divf %209, %210 : vector<16x1xf32>
    %212 = vector.broadcast %211 : vector<16x1xf32> to vector<16x32xf32>
    %213 = arith.subf %205, %212 : vector<16x32xf32>
    %214 = arith.mulf %213, %213 : vector<16x32xf32>
    %cst_59 = arith.constant dense<0.000000e+00> : vector<16xf32>
    %215 = vector.multi_reduction <add>, %214, %cst_59 [1] : vector<16x32xf32> to vector<16xf32>
    %216 = vector.shape_cast %215 : vector<16xf32> to vector<16x1xf32>
    %cst_60 = arith.constant 3.200000e+01 : f32
    %217 = vector.broadcast %cst_60 : f32 to vector<16x1xf32>
    %218 = arith.divf %216, %217 : vector<16x1xf32>
    %219 = vector.broadcast %211 : vector<16x1xf32> to vector<16x32xf32>
    %220 = arith.subf %205, %219 : vector<16x32xf32>
    %cst_61 = arith.constant 9.99999974E-6 : f32
    %221 = vector.broadcast %cst_61 : f32 to vector<16x1xf32>
    %222 = arith.addf %218, %221 : vector<16x1xf32>
    %223 = math.rsqrt %222 : vector<16x1xf32>
    %224 = vector.broadcast %223 : vector<16x1xf32> to vector<16x32xf32>
    %225 = arith.mulf %220, %224 : vector<16x32xf32>
    %226 = vector.broadcast %206 : vector<1x32xf32> to vector<16x32xf32>
    %227 = arith.mulf %225, %226 : vector<16x32xf32>
    %228 = vector.broadcast %207 : vector<1x32xf32> to vector<16x32xf32>
    %229 = arith.addf %227, %228 : vector<16x32xf32>
    %cst_62 = arith.constant dense<0.000000e+00> : vector<16x64xf32>
    %230 = tpu.matmul %229, %140, %cst_62 {dimension_numbers = #tpu.dot_dimension_numbers<[1], [0], [0], [1], [0, 0, 1, 1], [], []>} : vector<16x32xf32>, vector<32x64xf32>, vector<16x64xf32> -> vector<16x64xf32>
    %231 = vector.extract_strided_slice %137 {offsets = [3, 0], sizes = [1, 64], strides = [1, 1]} : vector<16x96xf32> to vector<1x64xf32>
    %232 = vector.broadcast %231 : vector<1x64xf32> to vector<16x64xf32>
    %233 = arith.addf %230, %232 : vector<16x64xf32>
    %cst_63 = arith.constant 0.000000e+00 : f32
    %234 = vector.broadcast %cst_63 : f32 to vector<16x64xf32>
    %235 = arith.maximumf %233, %234 : vector<16x64xf32>
    %cst_64 = arith.constant dense<0.000000e+00> : vector<16x32xf32>
    %236 = tpu.matmul %235, %141, %cst_64 {dimension_numbers = #tpu.dot_dimension_numbers<[1], [0], [0], [1], [0, 0, 1, 1], [], []>} : vector<16x64xf32>, vector<64x32xf32>, vector<16x32xf32> -> vector<16x32xf32>
    %237 = vector.extract_strided_slice %137 {offsets = [4, 0], sizes = [1, 32], strides = [1, 1]} : vector<16x96xf32> to vector<1x32xf32>
    %238 = vector.broadcast %237 : vector<1x32xf32> to vector<16x32xf32>
    %239 = arith.addf %236, %238 : vector<16x32xf32>
    %240 = arith.addf %229, %239 : vector<16x32xf32>
    %241 = vector.extract_strided_slice %137 {offsets = [9, 0], sizes = [1, 32], strides = [1, 1]} : vector<16x96xf32> to vector<1x32xf32>
    %242 = vector.extract_strided_slice %137 {offsets = [10, 0], sizes = [1, 32], strides = [1, 1]} : vector<16x96xf32> to vector<1x32xf32>
    %cst_65 = arith.constant dense<0.000000e+00> : vector<16xf32>
    %243 = vector.multi_reduction <add>, %240, %cst_65 [1] : vector<16x32xf32> to vector<16xf32>
    %244 = vector.shape_cast %243 : vector<16xf32> to vector<16x1xf32>
    %cst_66 = arith.constant 3.200000e+01 : f32
    %245 = vector.broadcast %cst_66 : f32 to vector<16x1xf32>
    %246 = arith.divf %244, %245 : vector<16x1xf32>
    %247 = vector.broadcast %246 : vector<16x1xf32> to vector<16x32xf32>
    %248 = arith.subf %240, %247 : vector<16x32xf32>
    %249 = arith.mulf %248, %248 : vector<16x32xf32>
    %cst_67 = arith.constant dense<0.000000e+00> : vector<16xf32>
    %250 = vector.multi_reduction <add>, %249, %cst_67 [1] : vector<16x32xf32> to vector<16xf32>
    %251 = vector.shape_cast %250 : vector<16xf32> to vector<16x1xf32>
    %cst_68 = arith.constant 3.200000e+01 : f32
    %252 = vector.broadcast %cst_68 : f32 to vector<16x1xf32>
    %253 = arith.divf %251, %252 : vector<16x1xf32>
    %254 = vector.broadcast %246 : vector<16x1xf32> to vector<16x32xf32>
    %255 = arith.subf %240, %254 : vector<16x32xf32>
    %cst_69 = arith.constant 9.99999974E-6 : f32
    %256 = vector.broadcast %cst_69 : f32 to vector<16x1xf32>
    %257 = arith.addf %253, %256 : vector<16x1xf32>
    %258 = math.rsqrt %257 : vector<16x1xf32>
    %259 = vector.broadcast %258 : vector<16x1xf32> to vector<16x32xf32>
    %260 = arith.mulf %255, %259 : vector<16x32xf32>
    %261 = vector.broadcast %241 : vector<1x32xf32> to vector<16x32xf32>
    %262 = arith.mulf %260, %261 : vector<16x32xf32>
    %263 = vector.broadcast %242 : vector<1x32xf32> to vector<16x32xf32>
    %264 = arith.addf %262, %263 : vector<16x32xf32>
    %c0_70 = arith.constant 0 : index
    %c0_71 = arith.constant 0 : index
    %265 = vector.load %arg5[%c0_70, %c0_71] : memref<16x32xf32, #tpu.memory_space<vmem>>, vector<16x32xf32>
    tpu.vector_store %arg5[%c0_70, %c0_71], %264 {strides = array<i32>} : memref<16x32xf32, #tpu.memory_space<vmem>>, vector<16x32xf32>,
    return
  }
}

</mosaic_0001>

<bundles_post_ra>
// kernel: image_captioning_forward.1
= control target key start
LH: loop header
LB: loop body
LE: loop exit
PB: predicated region body
PF: predicated region fallthrough
CT: control target
= control target key end

     0   :  { %v60_v0 = vlaneseq  ;;  %v7160_v4 = vmov 1983009808   ;;  %v7161_v6 = vmov 0.0|0.0   ;;  %vm7162_vm0 = vmmov 0   ;;  %s7164_s30 = smov 88   ;;  %s7165_s6 = smov 96   ;;  %s8455_s2 = inlined_call_operand.vmem [shape: f32[32,1024], index: 2, kind: input, shape index: {}]   ;;  %s8456_s0 = inlined_call_operand.vmem [shape: f32[2,1024], index: 0, kind: input, shape index: {}]   ;;  %s8457_s3 = inlined_call_operand.vmem [shape: f32[352,96], index: 3, kind: input, shape index: {}]   ;;  %s8458_s1 = inlined_call_operand.vmem [shape: f32[2,8,32], index: 1, kind: input, shape index: {}]   ;;  %s8459_s4 = inlined_call_operand.vmem [shape: f32[2,16,96], index: 4, kind: input, shape index: {}]   ;;  %s8460_s5 = inlined_call_operand.vmem [shape: f32[16,32], index: 5, kind: output, shape index: {}]  }
   0x1   :  { %v23_v1 = vld [vmem:[%s8455_s2 + $0x8] sm:$0xff]  ;;  %v22_v3 = vld [vmem:[%s8455_s2] sm:$0xff]  ;;  %v58_v5 = vunpack.c.l.s4 %v7160_v4  ;;  %6953 = vmatprep.subr.bf16.mxu1 %v7161_v6  ;;  %v25_v20 = vld [vmem:[%s8455_s2 + $0x18] sm:$0xff]  ;;  %vm382_vm1 = vcmask 261120   ;;  %s7166_s7 = smov 72   ;;  %s7167_s8 = smov 80  }
   0x2   :  { %v31_v2 = vld [vmem:[%s8455_s2 + $0x48] sm:$0xff]  ;;  %v30_v8 = vld [vmem:[%s8455_s2 + $0x40] sm:$0xff]  ;;  %v7229_v11 = vshrl.u32 %v60_v0, 7  ;;  %v33_v21 = vld [vmem:[%s8455_s2 + $0x58] sm:$0xff]  ;;  %s7168_s9 = smov 120   ;;  %s7169_s10 = smov 112  }
   0x3   :  { %v6921_v7 = vpack.c.bf16 %v31_v2, %v23_v1  ;;  %v39_v9 = vld [vmem:[%s8455_s2 + $0x88] sm:$0xff]  ;;  %v6923_v12 = vpack.c.bf16 %v30_v8, %v22_v3  ;;  %v59_v14 = vunpack.c.0.s8 %v58_v5  ;;  %v20_v15 = vld [vmem:[%s8456_s0] sm:$0xff]  ;;  %v6929_v25 = vpack.c.bf16 %v33_v21, %v25_v20  ;;  %v380_v30 = vld [vmem:[%s8457_s3 + $0x90] sm:$0xff]  ;;  %s7170_s11 = smov 104   ;;  %s7171_s12 = smov 64  }
   0x4   :  { %v47_v10 = vld [vmem:[%s8455_s2 + $0xc8] sm:$0xff]  ;;  %v38_v17 = vld [vmem:[%s8455_s2 + $0x80] sm:$0xff]  ;;  %v56_v23 = vcombine.high %v20_v15, %v20_v15  ;;  %v381_v31 = vld [vmem:[%s8457_s3 + $0x98] sm:$0xff]  ;;  %s7172_s13 = smov 56   ;;  %s7173_s14 = smov 48   ;;  %vm1454_vm2 = vcmask 64512  }
   0x5   :  { %v6925_v13 = vpack.c.bf16 %v47_v10, %v39_v9  ;;  %6922 = vmatprep.subr.bf16.mxu0 %v6921_v7  ;;  %v7235_v16 = vsub.s32 %v59_v14, %v7229_v11  ;;  %v46_v18 = vld [vmem:[%s8455_s2 + $0xc0] sm:$0xff]  ;;  %v379_v27 = vld [vmem:[%s8457_s3 + $0x88] sm:$0xff]  ;;  %v24_v32 = vld [vmem:[%s8455_s2 + $0x10] sm:$0xff]  ;;  %v6957_v36 = vpack.c.bf16 %v381_v31, %v380_v30  ;;  %s7174_s15 = smov 40   ;;  %v7175_v31 = vmov 1934713408  }
   0x6   :  { %6924 = vmatpush1.bf16.xpose.msra.mxu0 %v6923_v12  ;;  %v6927_v22 = vpack.c.bf16 %v46_v18, %v38_v17  ;;  %v378_v26 = vld [vmem:[%s8457_s3 + $0x80] sm:$0xff]  ;;  %v32_v33 = vld [vmem:[%s8455_s2 + $0x50] sm:$0xff]  ;;  %v41_v34 = vld [vmem:[%s8455_s2 + $0x98] sm:$0xff]  ;;  %s7176_s16 = smov 8   ;;  %s7177_s17 = smov 16   ;;  %vm3009_vm3 = vcmask 130048  }
   0x7   :  { %6926 = vmatprep.subr.bf16.mxu0 %v6925_v13  ;;  %v63_v19 = vrot.slane %v20_v15, %v7235_v16  ;;  %v70_v28 = vrot.slane %v56_v23, %v7235_v16  ;;  %v6954_v29 = vpack.c.bf16 %v379_v27, %v378_v26  ;;  %v49_v35 = vld [vmem:[%s8455_s2 + $0xd8] sm:$0xff]  ;;  %v6931_v37 = vpack.c.bf16 %v32_v33, %v24_v32  ;;  %v40_v40 = vld [vmem:[%s8455_s2 + $0x90] sm:$0xff]  ;;  %v27_v42 = vld [vmem:[%s8455_s2 + $0x28] sm:$0xff]  ;;  %s7178_s18 = smov 24  }
   0x8   :  { %v6933_v39 = vpack.c.bf16 %v49_v35, %v41_v34  ;;  %v48_v41 = vld [vmem:[%s8455_s2 + $0xd0] sm:$0xff]  ;;  %v35_v43 = vld [vmem:[%s8455_s2 + $0x68] sm:$0xff]  ;;  %v26_v48 = vld [vmem:[%s8455_s2 + $0x20] sm:$0xff]  ;;  %v7163_v13 = vmov 0.0   ;;  %v705_v32 = vunpack.c.l.s4 %v7175_v31  ;;  %vm3012_vm4 = vcmask 195584  }
   0x9   :  { %v71_v24 = vcombine.high %v63_v19, %v63_v19  ;;  %6955 = vmatpush3.bf16.msra.mxu1 %v6954_v29  ;;  %v72_v38 = vcombine.high %v70_v28, %v70_v28  ;;  %v6935_v44 = vpack.c.bf16 %v48_v41, %v40_v40  ;;  %v21_v45 = vld [vmem:[%s8456_s0 + $0x8] sm:$0xff]  ;;  %v6937_v46 = vpack.c.bf16 %v35_v43, %v27_v42  ;;  %v34_v49 = vld [vmem:[%s8455_s2 + $0x60] sm:$0xff]  ;;  %v29_v57 = vld [vmem:[%s8455_s2 + $0x38] sm:$0xff] }
   0xa   :  { %6956 = vmatprep.subr.bf16.mxu1 %v7161_v6  ;;  %v80_v47 = vrot.slane %v21_v45, %v7235_v16  ;;  %v43_v50 = vld [vmem:[%s8455_s2 + $0xa8] sm:$0xff]  ;;  %v6939_v52 = vpack.c.bf16 %v34_v49, %v26_v48  ;;  %v42_v55 = vld [vmem:[%s8455_s2 + $0xa0] sm:$0xff]  ;;  %v37_v58 = vld [vmem:[%s8455_s2 + $0x78] sm:$0xff]  ;;  %v73_v59 = vcombine.high %v21_v45, %v21_v45  ;;  %6654 = vmatprep.mubr.msk.f32.mxu1 %vm7162_vm0, %v7163_v13  ;;  %v706_v35 = vunpack.c.0.s8 %v705_v32 }
   0xb   :  { %162 = vmatprep.mubr.f32.mxu0 %v71_v24  ;;  %v51_v51 = vld [vmem:[%s8455_s2 + $0xe8] sm:$0xff]  ;;  %v50_v56 = vld [vmem:[%s8455_s2 + $0xe0] sm:$0xff]  ;;  %v6945_v61 = vpack.c.bf16 %v37_v58, %v29_v57  ;;  %v28_v63 = vld [vmem:[%s8455_s2 + $0x30] sm:$0xff]  ;;  %v7366_v24 = vsub.s32 0, %v7229_v11  ;;  %vm3305_vm5 = vcmask 523264  }
   0xc   :  { %v88_v53 = vcombine.high %v80_v47, %v80_v47  ;;  %v6941_v54 = vpack.c.bf16 %v51_v51, %v43_v50  ;;  %v6943_v60 = vpack.c.bf16 %v50_v56, %v42_v55  ;;  %v87_v62 = vrot.slane %v73_v59, %v7235_v16  ;;  %v36_v0 = vld [vmem:[%s8455_s2 + $0x70] sm:$0xff]  ;;  %v45_v1 = vld [vmem:[%s8455_s2 + $0xb8] sm:$0xff]  ;;  %v460_v9 = vld [vmem:[%s8457_s3] sm:$0xff] }
   0xd   :  { %6958 = vmatpush3.bf16.msra.mxu1 %v6957_v36  ;;  %v53_v2 = vld [vmem:[%s8455_s2 + $0xf8] sm:$0xff]  ;;  %v6947_v3 = vpack.c.bf16 %v36_v0, %v28_v63  ;;  %v44_v6 = vld [vmem:[%s8455_s2 + $0xb0] sm:$0xff]  ;;  %v461_v10 = vld [vmem:[%s8457_s3 + $0x8] sm:$0xff]  ;;  %v7419_v42 = vsub.s32 %v706_v35, %v7229_v11 }
   0xe   :  { %6928 = vmatpush1.bf16.xpose.msra.mxu0 %v6927_v22  ;;  %v89_v4 = vcombine.high %v87_v62, %v87_v62  ;;  %v6949_v5 = vpack.c.bf16 %v53_v2, %v45_v1  ;;  %v52_v7 = vld [vmem:[%s8455_s2 + $0xf0] sm:$0xff]  ;;  %v6959_v12 = vpack.c.bf16 %v461_v10, %v460_v9  ;;  %v463_v15 = vld [vmem:[%s8457_s3 + $0x18] sm:$0xff]  ;;  %v456_v18 = vld [vmem:[%s8458_s1] sm:$0xff] }
   0xf   :  { %6930 = vmatprep.subr.bf16.mxu0 %v6929_v25  ;;  %v6951_v8 = vpack.c.bf16 %v52_v7, %v44_v6  ;;  %v462_v14 = vld [vmem:[%s8457_s3 + $0x10] sm:$0xff]  ;;  %v457_v21 = vld [vmem:[%s8458_s1 + $0x8] sm:$0xff]  ;;  %v458_v25 = vld [vmem:[%s8459_s4] sm:$0xff] }
  0x10   :  { %6960 = vmatprep.subr.bf16.mxu1 %v6959_v12  ;;  %v6963_v17 = vpack.c.bf16 %v463_v15, %v462_v14  ;;  %v488_v26 = vrot.slane %v458_v25, %v7366_v24 }
  0x15   :  { %163 = vmatmul.mubr.f32.vlgmr.msra.gmra.mrb[0].mxu0 %v63_v19 }
  0x16   :  { %6932 = vmatpush1.bf16.xpose.msra.mxu0 %v6931_v37  ;;  %232 = vmatprep.mubr.f32.mxu0 %v72_v38 }
  0x17   :  { %6934 = vmatprep.subr.bf16.mxu0 %v6933_v39 }
  0x1e   :  { %6936 = vmatpush1.bf16.xpose.msra.mxu0 %v6935_v44 }
  0x1f   :  { %6938 = vmatprep.subr.bf16.mxu0 %v6937_v46 }
  0x25   :  { %233 = vmatmul.mubr.f32.vlgmr.msra.gmra.mrb[0].mxu0 %v70_v28 }
  0x26   :  { %6940 = vmatpush1.bf16.xpose.msra.mxu0 %v6939_v52  ;;  %302 = vmatprep.mubr.f32.mxu0 %v88_v53 }
  0x27   :  { %6942 = vmatprep.subr.bf16.mxu0 %v6941_v54 }
  0x2e   :  { %6944 = vmatpush1.bf16.xpose.msra.mxu0 %v6943_v60 }
  0x2f   :  { %6946 = vmatprep.subr.bf16.mxu0 %v6945_v61 }
  0x35   :  { %303 = vmatmul.mubr.f32.vlgmr.msra.gmra.mrb[0].mxu0 %v80_v47 }
  0x36   :  { %6948 = vmatpush1.bf16.xpose.msra.mxu0 %v6947_v3  ;;  %372 = vmatprep.mubr.f32.mxu0 %v89_v4 }
  0x37   :  { %6950 = vmatprep.subr.bf16.mxu0 %v6949_v5 }
  0x3e   :  { %6952 = vmatpush1.bf16.xpose.msra.mxu0 %v6951_v8 }
  0x3f   :  { %6728 = vmatprep.subr.mxu0 %v7163_v13 }
  0x45   :  { %373 = vmatmul.mubr.f32.vlgmr.msra.gmra.mrb[0].mxu0 %v87_v62 }
  0x46   :  { %6730 = vmatprep.mubr.msk.f32.mxu0 %vm7162_vm0, %v7163_v13 }
 0x118   :  { %v374_v19 = vpop.f32.mrb[0].mxu0 }
 0x119   :  { %v376_v20 = vpop.f32.mrb[1].mxu0  ;;  %6655 = vmatmul.mubr.msk.f32.vlgmr.msra.gmra.mrb[0].mxu1 %vm382_vm1, %v374_v19 }
 0x11a   :  { %6962 = vmatpush3.bf16.msra.mxu1 %v6959_v12  ;;  %6665 = vmatprep.mubr.msk.f32.mxu1 %vm382_vm1, %v456_v18 }
 0x11b   :  { %6964 = vmatprep.subr.bf16.mxu1 %v6963_v17 }
 0x11e   :  { %6966 = vmatpush3.bf16.msra.mxu1 %v6963_v17 }
 0x11f   :  { %6668 = vmatprep.subr.mxu1 %v7163_v13 }
 0x121   :  { %6666 = vmatmul.mubr.msk.f32.vlgmr.msra.gmra.mrb[2].mxu1 %vm382_vm1, %v457_v21 }
 0x122   :  { %6670 = vmatprep.mubr.msk.f32.mxu1 %vm7162_vm0, %v7163_v13 }
 0x1ec   :  { %v7363_v22 = vpop.f32.mrb[0].mxu1 }
 0x1ed   :  { %v6656_v23 = vpop.f32.mrb[1].mxu1 }
 0x1f4   :  { %v6667_v27 = vpop.f32.mrb[2].mxu1 }
 0x1f5   :  { %v7372_v28 = vadd.f32 %v6667_v27, %v488_v26  ;;  %v561_v29 = vpop.f32.mrb[3].mxu1 }
 0x1f6   :  { %v7382_v30 = vadd.f32 %v561_v29, %v488_v26 }
 0x1f7   :  { %598 = vrot.lane.b32.xlu0 %v7372_v28, %s7164_s30  ;;  %592 = vrot.lane.b32.xlu1 %v7372_v28, %s7165_s6 }
 0x1fb   :  { %610 = vrot.lane.b32.xlu0 %v7372_v28, %s7166_s7  ;;  %604 = vrot.lane.b32.xlu1 %v7372_v28, %s7167_s8 }
 0x1ff   :  { %574 = vrot.lane.b32.xlu1 %v7372_v28, %s7168_s9  ;;  %590 = vrot.lane.b32.xlu0 %v7382_v30, %s7165_s6 }
 0x203   :  { %602 = vrot.lane.b32.xlu1 %v7382_v30, %s7167_s8  ;;  %596 = vrot.lane.b32.xlu0 %v7382_v30, %s7164_s30 }
 0x207   :  { %608 = vrot.lane.b32.xlu1 %v7382_v30, %s7166_s7  ;;  %572 = vrot.lane.b32.xlu0 %v7382_v30, %s7168_s9 }
 0x20b   :  { %578 = vrot.lane.b32.xlu1 %v7382_v30, %s7169_s10  ;;  %584 = vrot.lane.b32.xlu0 %v7382_v30, %s7170_s11 }
 0x20f   :  { %586 = vrot.lane.b32.xlu1 %v7372_v28, %s7170_s11  ;;  %580 = vrot.lane.b32.xlu0 %v7372_v28, %s7169_s10 }
 0x213   :  { %616 = vrot.lane.b32.xlu1 %v7372_v28, %s7171_s12  ;;  %614 = vrot.lane.b32.xlu0 %v7382_v30, %s7171_s12 }
 0x217   :  { %622 = vrot.lane.b32.xlu1 %v7372_v28, %s7172_s13  ;;  %626 = vrot.lane.b32.xlu0 %v7382_v30, %s7173_s14 }
 0x21b   :  { %628 = vrot.lane.b32.xlu1 %v7372_v28, %s7173_s14 }
 0x21f   :  { %620 = vrot.lane.b32.xlu1 %v7382_v30, %s7172_s13 }
 0x223   :  { %632 = vrot.lane.b32.xlu1 %v7382_v30, %s7174_s15 }
 0x269   :  { %v599_v33 = vpop.permute.xlu0 %598  ;;  %v593_v34 = vpop.permute.xlu1 %592 }
 0x26d   :  { %v611_v36 = vpop.permute.xlu0 %610  ;;  %v605_v37 = vpop.permute.xlu1 %604 }
 0x26e   :  { %v890_v38 = vcombine.low %v599_v33, %v611_v36  ;;  %v891_v39 = vcombine.high %v599_v33, %v611_v36  ;;  %v874_v40 = vcombine.low %v593_v34, %v605_v37  ;;  %v875_v41 = vcombine.high %v593_v34, %v605_v37 }
 0x270   :  { %v898_v43 = vrot.slane %v890_v38, %v7235_v16  ;;  %v905_v44 = vrot.slane %v891_v39, %v7235_v16  ;;  %v882_v45 = vrot.slane %v874_v40, %v7235_v16  ;;  %v889_v46 = vrot.slane %v875_v41, %v7235_v16 }
 0x271   :  { %v7425_v47 = vpop.permute.xlu1 %574  ;;  %v591_v48 = vpop.permute.xlu0 %590 }
 0x272   :  { %v938_v49 = vcombine.low %v882_v45, %v898_v43  ;;  %v939_v50 = vcombine.high %v882_v45, %v898_v43  ;;  %v954_v51 = vcombine.low %v889_v46, %v905_v44  ;;  %v955_v52 = vcombine.high %v889_v46, %v905_v44 }
 0x274   :  { %v946_v53 = vrot.slane %v938_v49, %v7419_v42  ;;  %v953_v54 = vrot.slane %v939_v50, %v7419_v42  ;;  %v962_v55 = vrot.slane %v954_v51, %v7419_v42  ;;  %v969_v56 = vrot.slane %v955_v52, %v7419_v42 }
 0x275   :  { %v603_v57 = vpop.permute.xlu1 %602  ;;  %v597_v58 = vpop.permute.xlu0 %596 }
 0x276   :  { %v6418_v59 = vcombine.low %v946_v53, %v953_v54  ;;  %v6420_v60 = vcombine.high %v946_v53, %v953_v54  ;;  %v6422_v61 = vcombine.low %v962_v55, %v969_v56  ;;  %v6424_v62 = vcombine.high %v962_v55, %v969_v56 }
 0x277   :  { %v670_v63 = vcombine.low %v591_v48, %v603_v57  ;;  %v671_v0 = vcombine.high %v591_v48, %v603_v57 }
 0x278   :  { %v7432_v5 = vrot.slane %v6418_v59, %v7235_v16  ;;  %v7435_v6 = vrot.slane %v6420_v60, %v7235_v16  ;;  %v7438_v7 = vrot.slane %v6422_v61, %v7235_v16  ;;  %v7441_v8 = vrot.slane %v6424_v62, %v7235_v16 }
 0x279   :  { %v609_v1 = vpop.permute.xlu1 %608  ;;  %v573_v2 = vpop.permute.xlu0 %572  ;;  %v678_v9 = vrot.slane %v670_v63, %v7235_v16  ;;  %v685_v10 = vrot.slane %v671_v0, %v7235_v16 }
 0x27a   :  { %v686_v3 = vcombine.low %v597_v58, %v609_v1  ;;  %v687_v4 = vcombine.high %v597_v58, %v609_v1 }
 0x27c   :  { %v694_v12 = vrot.slane %v686_v3, %v7235_v16  ;;  %v701_v14 = vrot.slane %v687_v4, %v7235_v16 }
 0x27d   :  { %v579_v15 = vpop.permute.xlu1 %578  ;;  %v585_v17 = vpop.permute.xlu0 %584 }
 0x27e   :  { %v638_v18 = vcombine.low %v7382_v30, %v579_v15  ;;  %v639_v19 = vcombine.high %v7382_v30, %v579_v15  ;;  %v654_v20 = vcombine.low %v573_v2, %v585_v17  ;;  %v655_v21 = vcombine.high %v573_v2, %v585_v17 }
 0x27f   :  { %v734_v23 = vcombine.low %v678_v9, %v694_v12  ;;  %v735_v25 = vcombine.high %v678_v9, %v694_v12  ;;  %v750_v26 = vcombine.low %v685_v10, %v701_v14  ;;  %v751_v27 = vcombine.high %v685_v10, %v701_v14 }
 0x280   :  { %v646_v29 = vrot.slane %v638_v18, %v7235_v16  ;;  %v653_v31 = vrot.slane %v639_v19, %v7235_v16  ;;  %v662_v32 = vrot.slane %v654_v20, %v7235_v16  ;;  %v669_v33 = vrot.slane %v655_v21, %v7235_v16 }
 0x281   :  { %v742_v34 = vrot.slane %v734_v23, %v7419_v42  ;;  %v749_v35 = vrot.slane %v735_v25, %v7419_v42  ;;  %v758_v30 = vrot.slane %v750_v26, %v7419_v42  ;;  %v765_v36 = vrot.slane %v751_v27, %v7419_v42  ;;  %v587_v37 = vpop.permute.xlu1 %586  ;;  %v581_v56 = vpop.permute.xlu0 %580 }
 0x282   :  { %v702_v38 = vcombine.low %v646_v29, %v662_v32  ;;  %v703_v39 = vcombine.high %v646_v29, %v662_v32  ;;  %v718_v40 = vcombine.low %v653_v31, %v669_v33  ;;  %v719_v41 = vcombine.high %v653_v31, %v669_v33 }
 0x283   :  { %v6410_v43 = vcombine.low %v742_v34, %v749_v35  ;;  %v6412_v44 = vcombine.high %v742_v34, %v749_v35  ;;  %v6414_v45 = vcombine.low %v758_v30, %v765_v36  ;;  %v6416_v46 = vcombine.high %v758_v30, %v765_v36 }
 0x284   :  { %v710_v48 = vrot.slane %v702_v38, %v7419_v42  ;;  %v717_v49 = vrot.slane %v703_v39, %v7419_v42  ;;  %v726_v50 = vrot.slane %v718_v40, %v7419_v42  ;;  %v733_v51 = vrot.slane %v719_v41, %v7419_v42 }
 0x285   :  { %v7462_v52 = vrot.slane %v6410_v43, %v7235_v16  ;;  %v7465_v53 = vrot.slane %v6412_v44, %v7235_v16  ;;  %v7468_v54 = vrot.slane %v6414_v45, %v7235_v16  ;;  %v7471_v55 = vrot.slane %v6416_v46, %v7235_v16  ;;  %v7473_v57 = vpop.permute.xlu1 %616  ;;  %v615_v21 = vpop.permute.xlu0 %614 }
 0x286   :  { %v6409_v58 = vcombine.low %v710_v48, %v717_v49  ;;  %v6411_v59 = vcombine.high %v710_v48, %v717_v49  ;;  %v6413_v60 = vcombine.low %v726_v50, %v733_v51  ;;  %v6415_v61 = vcombine.high %v726_v50, %v733_v51 }
 0x287   :  { %v1126_v62 = vcombine.low %v7462_v52, %v7465_v53  ;;  %v1158_v63 = vcombine.low %v7468_v54, %v7471_v55  ;;  %v858_v4 = vcombine.low %v7425_v47, %v587_v37  ;;  %v859_v9 = vcombine.high %v7425_v47, %v587_v37 }
 0x288   :  { %v7480_v0 = vrot.slane %v6409_v58, %v7235_v16  ;;  %v7483_v1 = vrot.slane %v6411_v59, %v7235_v16  ;;  %v7486_v2 = vrot.slane %v6413_v60, %v7235_v16  ;;  %v7489_v3 = vrot.slane %v6415_v61, %v7235_v16 }
 0x289   :  { %v842_v10 = vcombine.low %v7372_v28, %v581_v56  ;;  %v843_v12 = vcombine.high %v7372_v28, %v581_v56  ;;  %v7495_v14 = vpop.permute.xlu1 %622  ;;  %v1262_v15 = vcombine.low %v7432_v5, %v7435_v6  ;;  %v1294_v17 = vcombine.low %v7438_v7, %v7441_v8  ;;  %v627_v51 = vpop.permute.xlu0 %626 }
 0x28a   :  { %v866_v18 = vrot.slane %v858_v4, %v7235_v16  ;;  %v873_v19 = vrot.slane %v859_v9, %v7235_v16  ;;  %v1110_v23 = vcombine.low %v7480_v0, %v7483_v1  ;;  %v1142_v25 = vcombine.low %v7486_v2, %v7489_v3 }
 0x28b   :  { %v850_v20 = vrot.slane %v842_v10, %v7235_v16  ;;  %v857_v47 = vrot.slane %v843_v12, %v7235_v16  ;;  %v7510_v26 = vrot.slane %v1126_v62, %v7419_v42  ;;  %v7513_v27 = vrot.slane %v1158_v63, %v7419_v42 }
 0x28c   :  { %v7522_v36 = vrot.slane %v1262_v15, %v7419_v42  ;;  %v7525_v37 = vrot.slane %v1294_v17, %v7419_v42  ;;  %v7535_v44 = vrot.slane %v1110_v23, %v7419_v42  ;;  %v7538_v45 = vrot.slane %v1142_v25, %v7419_v42 }
 0x28d   :  { %v906_v29 = vcombine.low %v850_v20, %v866_v18  ;;  %v907_v31 = vcombine.high %v850_v20, %v866_v18  ;;  %v922_v32 = vcombine.low %v857_v47, %v873_v19  ;;  %v923_v33 = vcombine.high %v857_v47, %v873_v19  ;;  %v7515_v34 = vpop.permute.xlu1 %628 }
 0x28e   :  { %v1178_v35 = vcombine.low %v7510_v26, %v7513_v27  ;;  %v978_v30 = vcombine.low %v7473_v57, %v7515_v34  ;;  %v979_v43 = vcombine.high %v7473_v57, %v7515_v34  ;;  %v1174_v58 = vcombine.low %v7535_v44, %v7538_v45 }
 0x28f   :  { %v914_v38 = vrot.slane %v906_v29, %v7419_v42  ;;  %v921_v39 = vrot.slane %v907_v31, %v7419_v42  ;;  %v930_v40 = vrot.slane %v922_v32, %v7419_v42  ;;  %v937_v41 = vrot.slane %v923_v33, %v7419_v42 }
 0x290   :  { %6669 = vmatpush3.xpose.msk.msra.mxu1 %vm1454_vm2, %v1178_v35  ;;  %v1314_v59 = vcombine.low %v7522_v36, %v7525_v37  ;;  %v774_v4 = vcombine.low %v615_v21, %v627_v51  ;;  %v775_v9 = vcombine.high %v615_v21, %v627_v51  ;;  %v1263_v17 = vcombine.high %v7432_v5, %v7435_v6 }
 0x291   :  { %v6417_v46 = vcombine.low %v914_v38, %v921_v39  ;;  %v6419_v48 = vcombine.high %v914_v38, %v921_v39  ;;  %v6421_v49 = vcombine.low %v930_v40, %v937_v41  ;;  %v6423_v50 = vcombine.high %v930_v40, %v937_v41  ;;  %6673 = vmatprep.subr.mxu1 %v7163_v13  ;;  %v621_v56 = vpop.permute.xlu1 %620 }
 0x292   :  { %v1127_v20 = vcombine.high %v7462_v52, %v7465_v53  ;;  %v1159_v47 = vcombine.high %v7468_v54, %v7471_v55  ;;  %v782_v25 = vrot.slane %v774_v4, %v7235_v16  ;;  %v789_v5 = vrot.slane %v775_v9, %v7235_v16 }
 0x293   :  { %v7546_v60 = vrot.slane %v6417_v46, %v7235_v16  ;;  %v7549_v61 = vrot.slane %v6419_v48, %v7235_v16  ;;  %v7552_v62 = vrot.slane %v6421_v49, %v7235_v16  ;;  %v7555_v63 = vrot.slane %v6423_v50, %v7235_v16  ;;  %6671 = vmatmul.mubr.msk.f32.vlgmr.msra.gmra.mrb[4].mxu1 %vm1454_vm2, %v1174_v58 }
 0x294   :  { %6674 = vmatpush3.xpose.msk.msra.mxu1 %vm1454_vm2, %v1314_v59  ;;  %6675 = vmatprep.mubr.msk.f32.mxu1 %vm7162_vm0, %v7163_v13  ;;  %v1295_v31 = vcombine.high %v7438_v7, %v7441_v8  ;;  %v1179_v52 = vcombine.high %v7510_v26, %v7513_v27  ;;  %v1111_v35 = vcombine.high %v7480_v0, %v7483_v1 }
 0x295   :  { %v1246_v10 = vcombine.low %v7546_v60, %v7549_v61  ;;  %v1278_v12 = vcombine.low %v7552_v62, %v7555_v63  ;;  %v633_v15 = vpop.permute.xlu1 %632  ;;  %6678 = vmatprep.subr.mxu1 %v7163_v13  ;;  %v1141_v38 = vrot.slane %v1127_v20, %v7419_v42  ;;  %v1173_v39 = vrot.slane %v1159_v47, %v7419_v42 }
 0x296   :  { %v790_v18 = vcombine.low %v621_v56, %v633_v15  ;;  %v791_v19 = vcombine.high %v621_v56, %v633_v15  ;;  %v7588_v40 = vrot.slane %v1263_v17, %v7419_v42  ;;  %v1143_v0 = vcombine.high %v7486_v2, %v7489_v3 }
 0x297   :  { %v1254_v21 = vrot.slane %v1246_v10, %v7419_v42  ;;  %v1286_v23 = vrot.slane %v1278_v12, %v7419_v42  ;;  %v1175_v1 = vcombine.high %v7535_v44, %v7538_v45  ;;  %v1315_v41 = vcombine.high %v7522_v36, %v7525_v37 }
 0x298   :  { %v798_v6 = vrot.slane %v790_v18, %v7235_v16  ;;  %v805_v29 = vrot.slane %v791_v19, %v7235_v16  ;;  %v1247_v51 = vcombine.high %v7546_v60, %v7549_v61  ;;  %v1279_v2 = vcombine.high %v7552_v62, %v7555_v63 }
 0x299   :  { %v1310_v32 = vcombine.low %v1254_v21, %v1286_v23  ;;  %v1180_v3 = vcombine.low %v1141_v38, %v1173_v39  ;;  %v1309_v56 = vrot.slane %v1295_v31, %v7419_v42  ;;  %v1311_v58 = vcombine.high %v1254_v21, %v1286_v23 }
 0x29a   :  { %v806_v53 = vcombine.low %v782_v25, %v798_v6  ;;  %v807_v54 = vcombine.high %v782_v25, %v798_v6  ;;  %v822_v55 = vcombine.low %v789_v5, %v805_v29  ;;  %v823_v33 = vcombine.high %v789_v5, %v805_v29 }
 0x29b   :  { %6676 = vmatmul.mubr.msk.f32.vlgmr.msra.gmra.mrb[6].mxu1 %vm1454_vm2, %v1310_v32  ;;  %v1125_v59 = vrot.slane %v1111_v35, %v7419_v42  ;;  %v1157_v60 = vrot.slane %v1143_v0, %v7419_v42  ;;  %v1261_v17 = vrot.slane %v1247_v51, %v7419_v42  ;;  %v1293_v18 = vrot.slane %v1279_v2, %v7419_v42 }
 0x29c   :  { %6679 = vmatpush3.xpose.msk.msra.mxu1 %vm1454_vm2, %v1179_v52  ;;  %v814_v7 = vrot.slane %v806_v53, %v7419_v42  ;;  %v821_v8 = vrot.slane %v807_v54, %v7419_v42  ;;  %v830_v26 = vrot.slane %v822_v55, %v7419_v42  ;;  %v837_v27 = vrot.slane %v823_v33, %v7419_v42 }
 0x29d   :  { %6680 = vmatprep.mubr.msk.f32.mxu1 %vm7162_vm0, %v7163_v13  ;;  %6683 = vmatprep.subr.mxu1 %v7163_v13  ;;  %v1176_v15 = vcombine.low %v1125_v59, %v1157_v60  ;;  %v1316_v20 = vcombine.low %v7588_v40, %v1309_v56  ;;  %v1312_v25 = vcombine.low %v1261_v17, %v1293_v18 }
 0x29e   :  { %v1318_v46 = vcombine.low %v814_v7, %v821_v8  ;;  %v6425_v48 = vcombine.high %v814_v7, %v821_v8  ;;  %v1334_v49 = vcombine.low %v830_v26, %v837_v27  ;;  %v6426_v50 = vcombine.high %v830_v26, %v837_v27 }
 0x29f   :  { %6681 = vmatmul.mubr.msk.f32.vlgmr.msra.gmra.mrb[8].mxu1 %vm1454_vm2, %v1175_v1  ;;  %v1181_v5 = vcombine.high %v1141_v38, %v1173_v39  ;;  %v1177_v6 = vcombine.high %v1125_v59, %v1157_v60  ;;  %v1317_v29 = vcombine.high %v7588_v40, %v1309_v56  ;;  %v1313_v31 = vcombine.high %v1261_v17, %v1293_v18 }
 0x2a0   :  { %v1325_v44 = vrot.slane %v1318_v46, %v7235_v16  ;;  %v1333_v45 = vrot.slane %v6425_v48, %v7235_v16  ;;  %v1341_v36 = vrot.slane %v1334_v49, %v7235_v16  ;;  %v1349_v37 = vrot.slane %v6426_v50, %v7235_v16  ;;  %6684 = vmatpush3.xpose.msk.msra.mxu1 %vm1454_vm2, %v1315_v41 }
 0x2a1   :  { %6685 = vmatprep.mubr.msk.f32.mxu1 %vm7162_vm0, %v7163_v13  ;;  %6688 = vmatprep.subr.mxu1 %v7163_v13 }
 0x2a2   :  { %v1351_v61 = vcombine.high %v1325_v44, %v1333_v45  ;;  %v1367_v62 = vcombine.high %v1341_v36, %v1349_v37  ;;  %v1350_v63 = vcombine.low %v1325_v44, %v1333_v45  ;;  %v1366_v4 = vcombine.low %v1341_v36, %v1349_v37 }
 0x2a3   :  { %6686 = vmatmul.mubr.msk.f32.vlgmr.msra.gmra.mrb[10].mxu1 %vm1454_vm2, %v1311_v58 }
 0x2a4   :  { %6689 = vmatpush3.xpose.msk.msra.mxu1 %vm1454_vm2, %v1180_v3  ;;  %6690 = vmatprep.mubr.msk.f32.mxu1 %vm7162_vm0, %v7163_v13  ;;  %v7625_v9 = vrot.slane %v1351_v61, %v7419_v42  ;;  %v7628_v10 = vrot.slane %v1367_v62, %v7419_v42  ;;  %v7631_v12 = vrot.slane %v1350_v63, %v7419_v42 }
 0x2a5   :  { %6693 = vmatprep.subr.mxu1 %v7163_v13  ;;  %v7637_v19 = vrot.slane %v1366_v4, %v7419_v42 }
 0x2a6   :  { %v1384_v47 = vcombine.low %v7625_v9, %v7628_v10  ;;  %v1385_v21 = vcombine.high %v7625_v9, %v7628_v10 }
 0x2a7   :  { %6691 = vmatmul.mubr.msk.f32.vlgmr.msra.gmra.mrb[12].mxu1 %vm1454_vm2, %v1176_v15  ;;  %v1383_v23 = vcombine.high %v7631_v12, %v7637_v19  ;;  %v1382_v32 = vcombine.low %v7631_v12, %v7637_v19 }
 0x2a8   :  { %6694 = vmatpush3.xpose.msk.msra.mxu1 %vm1454_vm2, %v1316_v20  ;;  %6695 = vmatprep.mubr.msk.f32.mxu1 %vm7162_vm0, %v7163_v13 }
 0x2a9   :  { %6698 = vmatprep.subr.mxu1 %v7163_v13  ;;  %6729 = vmatpush3.msra.mxu0 %v1384_v47 }
 0x2aa   :  { %6738 = vmatprep.subr.mxu0 %v7163_v13 }
 0x2ab   :  { %6696 = vmatmul.mubr.msk.f32.vlgmr.msra.gmra.mrb[14].mxu1 %vm1454_vm2, %v1312_v25 }
 0x2ac   :  { %6699 = vmatpush3.xpose.msk.msra.mxu1 %vm1454_vm2, %v1181_v5  ;;  %6700 = vmatprep.mubr.msk.f32.mxu1 %vm7162_vm0, %v7163_v13 }
 0x2ad   :  { %6703 = vmatprep.subr.mxu1 %v7163_v13 }
 0x2af   :  { %6701 = vmatmul.mubr.msk.f32.vlgmr.msra.gmra.mrb[16].mxu1 %vm1454_vm2, %v1177_v6 }
 0x2b0   :  { %6704 = vmatpush3.xpose.msk.msra.mxu1 %vm1454_vm2, %v1317_v29  ;;  %6705 = vmatprep.mubr.msk.f32.mxu1 %vm7162_vm0, %v7163_v13 }
 0x2b1   :  { %6708 = vmatprep.subr.mxu1 %v7163_v13 }
 0x2b3   :  { %6706 = vmatmul.mubr.msk.f32.vlgmr.msra.gmra.mrb[18].mxu1 %vm1454_vm2, %v1313_v31 }
 0x2b4   :  { %6709 = vmatpush3.msra.mxu1 %v1382_v32  ;;  %6710 = vmatprep.mubr.msk.f32.mxu1 %vm7162_vm0, %v7163_v13 }
 0x2b5   :  { %6713 = vmatprep.subr.mxu1 %v7163_v13 }
 0x366   :  { %v1527_v52 = vpop.f32.mrb[4].mxu1 }
 0x367   :  { %v2063_v53 = vmul.f32 0.35355338, %v1527_v52  ;;  %v6672_v54 = vpop.f32.mrb[5].mxu1 }
 0x369   :  { %v2071_v55 = vmul.f32 1.442695, %v2063_v53 }
 0x36b   :  { %7068 = vpow2.f32 %v2071_v55 }
 0x36e   :  { %v1603_v33 = vpop.f32.mrb[6].mxu1 }
 0x36f   :  { %v2064_v35 = vmul.f32 0.35355338, %v1603_v33  ;;  %v6677_v38 = vpop.f32.mrb[7].mxu1 }
 0x371   :  { %v2073_v39 = vmul.f32 1.442695, %v2064_v35 }
 0x372   :  { %v1679_v40 = vpop.f32.mrb[8].mxu1 }
 0x373   :  { %7070 = vpow2.f32 %v2073_v39  ;;  %v2065_v7 = vmul.f32 0.35355338, %v1679_v40  ;;  %v6682_v8 = vpop.f32.mrb[9].mxu1  ;;  %v986_v40 = vrot.slane %v978_v30, %v7235_v16 }
 0x375   :  { %v2075_v26 = vmul.f32 1.442695, %v2065_v7  ;;  %v7069_v27 = vpop.eup %7068  ;;  %v993_v7 = vrot.slane %v979_v43, %v7235_v16 }
 0x376   :  { %v1755_v0 = vpop.f32.mrb[10].mxu1  ;;  %v2087_v41 = vsel %vm1454_vm2, %v7069_v27, 0.0 }
 0x377   :  { %7072 = vpow2.f32 %v2075_v26  ;;  %v6687_v1 = vpop.f32.mrb[11].mxu1  ;;  %2088 = vadd.xlane.f32.xlu0 %v2087_v41  ;;  %v2066_v31 = vmul.f32 0.35355338, %v1755_v0 }
 0x379   :  { %v2077_v32 = vmul.f32 1.442695, %v2066_v31 }
 0x37a   :  { %v1831_v46 = vpop.f32.mrb[12].mxu1 }
 0x37b   :  { %v2067_v48 = vmul.f32 0.35355338, %v1831_v46  ;;  %v6692_v49 = vpop.f32.mrb[13].mxu1 }
 0x37d   :  { %v7670_v50 = vpop.eup %7070  ;;  %v2079_v51 = vmul.f32 1.442695, %v2067_v48 }
 0x37e   :  { %v1907_v2 = vpop.f32.mrb[14].mxu1  ;;  %v2090_v3 = vsel %vm1454_vm2, %v7670_v50, 0.0 }
 0x37f   :  { %7074 = vpow2.f32 %v2079_v51  ;;  %v2068_v56 = vmul.f32 0.35355338, %v1907_v2  ;;  %2091 = vadd.xlane.f32.xlu1 %v2090_v3  ;;  %v6697_v44 = vpop.f32.mrb[15].mxu1 }
 0x381   :  { %v7674_v45 = vpop.eup %7072  ;;  %v2081_v36 = vmul.f32 1.442695, %v2068_v56 }
 0x382   :  { %v1983_v37 = vpop.f32.mrb[16].mxu1  ;;  %v2093_v58 = vsel %vm1454_vm2, %v7674_v45, 0.0 }
 0x383   :  { %7076 = vpow2.f32 %v2081_v36  ;;  %v2069_v59 = vmul.f32 0.35355338, %v1983_v37  ;;  %2094 = vadd.xlane.f32.xlu0 %v2093_v58  ;;  %v6702_v60 = vpop.f32.mrb[17].mxu1 }
 0x385   :  { %v2083_v61 = vmul.f32 1.442695, %v2069_v59 }
 0x386   :  { %v2059_v62 = vpop.f32.mrb[18].mxu1 }
 0x387   :  { %7078 = vpow2.f32 %v2083_v61  ;;  %v2070_v63 = vmul.f32 0.35355338, %v2059_v62  ;;  %v6707_v4 = vpop.f32.mrb[19].mxu1 }
 0x389   :  { %v7678_v15 = vpop.eup %7074  ;;  %v2085_v17 = vmul.f32 1.442695, %v2070_v63 }
 0x38a   :  { %v2099_v18 = vsel %vm1454_vm2, %v7678_v15, 0.0 }
 0x38b   :  { %7080 = vpow2.f32 %v2085_v17  ;;  %2100 = vadd.xlane.f32.xlu0 %v2099_v18 }
 0x38c   :  { %7082 = vpow2.f32 %v2077_v32 }
 0x38d   :  { %v7682_v20 = vpop.eup %7076 }
 0x38e   :  { %v2102_v47 = vsel %vm1454_vm2, %v7682_v20, 0.0 }
 0x38f   :  { %2103 = vadd.xlane.f32.xlu0 %v2102_v47 }
 0x390   :  { %634 = vrot.lane.b32.xlu1 %v7372_v28, %s7174_s15 }
 0x391   :  { %v7688_v25 = vpop.eup %7078 }
 0x392   :  { %v2105_v5 = vsel %vm1454_vm2, %v7688_v25, 0.0 }
 0x393   :  { %2106 = vadd.xlane.f32.xlu0 %v2105_v5 }
 0x395   :  { %v7692_v6 = vpop.eup %7080 }
 0x396   :  { %v2108_v29 = vsel %vm1454_vm2, %v7692_v6, 0.0  ;;  %v7696_v52 = vpop.eup %7082 }
 0x397   :  { %2109 = vadd.xlane.f32.xlu0 %v2108_v29  ;;  %v2096_v28 = vsel %vm1454_vm2, %v7696_v52, 0.0 }
 0x3b4   :  { %2097 = vadd.xlane.f32.xlu1 %v2096_v28 }
 0x404   :  { %v2089_v53 = vpop.xlane.xlu0 %2088 }
 0x405   :  { %7084 = vrcp.f32 %v2089_v53 }
 0x40c   :  { %v2092_v54 = vpop.xlane.xlu1 %2091 }
 0x40d   :  { %7086 = vrcp.f32 %v2092_v54 }
 0x40f   :  { %v7085_v55 = vpop.eup %7084 }
 0x410   :  { %v635_v33 = vpop.permute.xlu1 %634  ;;  %v2119_v35 = vmul.f32 %v7085_v55, %v7069_v27  ;;  %v2095_v27 = vpop.xlane.xlu0 %2094 }
 0x411   :  { %v994_v38 = vcombine.low %v7495_v14, %v635_v33  ;;  %v995_v39 = vcombine.high %v7495_v14, %v635_v33  ;;  %7088 = vrcp.f32 %v2095_v27 }
 0x412   :  { %6711 = vmatmul.mubr.msk.f32.vlgmr.msra.gmra.mrb[20].mxu1 %vm1454_vm2, %v2119_v35 }
 0x413   :  { %v1002_v8 = vrot.slane %v994_v38, %v7235_v16  ;;  %v1009_v26 = vrot.slane %v995_v39, %v7235_v16  ;;  %6715 = vmatprep.mubr.msk.f32.mxu1 %vm7162_vm0, %v7163_v13 }
 0x415   :  { %v1010_v14 = vcombine.low %v986_v40, %v1002_v8  ;;  %v1011_v0 = vcombine.high %v986_v40, %v1002_v8  ;;  %v1026_v1 = vcombine.low %v993_v7, %v1009_v26  ;;  %v1027_v30 = vcombine.high %v993_v7, %v1009_v26 }
 0x417   :  { %v1018_v41 = vrot.slane %v1010_v14, %v7419_v42  ;;  %v1025_v57 = vrot.slane %v1011_v0, %v7419_v42  ;;  %v1034_v34 = vrot.slane %v1026_v1, %v7419_v42  ;;  %v1041_v43 = vrot.slane %v1027_v30, %v7419_v42  ;;  %v7087_v61 = vpop.eup %7086 }
 0x418   :  { %v2101_v46 = vpop.xlane.xlu0 %2100  ;;  %v2120_v32 = vmul.f32 %v7087_v61, %v7670_v50 }
 0x419   :  { %v1386_v48 = vcombine.low %v1018_v41, %v1025_v57  ;;  %v6427_v49 = vcombine.high %v1018_v41, %v1025_v57  ;;  %v1402_v51 = vcombine.low %v1034_v34, %v1041_v43  ;;  %v6428_v2 = vcombine.high %v1034_v34, %v1041_v43 }
 0x41a   :  { %7090 = vrcp.f32 %v2101_v46 }
 0x41b   :  { %v1393_v3 = vrot.slane %v1386_v48, %v7235_v16  ;;  %v1401_v56 = vrot.slane %v6427_v49, %v7235_v16  ;;  %v1409_v44 = vrot.slane %v1402_v51, %v7235_v16  ;;  %v1417_v36 = vrot.slane %v6428_v2, %v7235_v16  ;;  %v7089_v31 = vpop.eup %7088 }
 0x41c   :  { %v2104_v37 = vpop.xlane.xlu0 %2103  ;;  %v2121_v33 = vmul.f32 %v7089_v31, %v7674_v45 }
 0x41d   :  { %v1418_v58 = vcombine.low %v1393_v3, %v1401_v56  ;;  %v1434_v59 = vcombine.low %v1409_v44, %v1417_v36  ;;  %v1419_v60 = vcombine.high %v1393_v3, %v1401_v56  ;;  %v1435_v62 = vcombine.high %v1409_v44, %v1417_v36 }
 0x41f   :  { %v1426_v63 = vrot.slane %v1418_v58, %v7419_v42  ;;  %v1442_v4 = vrot.slane %v1434_v59, %v7419_v42  ;;  %v1433_v17 = vrot.slane %v1419_v60, %v7419_v42  ;;  %v1449_v47 = vrot.slane %v1435_v62, %v7419_v42 }
 0x420   :  { %v2107_v18 = vpop.xlane.xlu0 %2106 }
 0x421   :  { %7092 = vrcp.f32 %v2107_v18  ;;  %v1450_v5 = vcombine.low %v1426_v63, %v1442_v4  ;;  %v1451_v29 = vcombine.high %v1426_v63, %v1442_v4  ;;  %v1452_v28 = vcombine.low %v1433_v17, %v1449_v47 }
 0x422   :  { %v1453_v53 = vcombine.high %v1433_v17, %v1449_v47 }
 0x423   :  { %6714 = vmatpush3.msra.mxu1 %v1450_v5 }
 0x424   :  { %v7091_v54 = vpop.eup %7090  ;;  %6716 = vmatmul.mubr.msk.f32.vlgmr.msra.gmra.mrb[22].mxu1 %vm1454_vm2, %v2120_v32  ;;  %6718 = vmatprep.subr.mxu1 %v7163_v13  ;;  %v2110_v9 = vpop.xlane.xlu0 %2109 }
 0x425   :  { %v2123_v55 = vmul.f32 %v7091_v54, %v7678_v15  ;;  %6719 = vmatpush3.msra.mxu1 %v1383_v23  ;;  %6720 = vmatprep.mubr.msk.f32.mxu1 %vm7162_vm0, %v7163_v13 }
 0x426   :  { %6723 = vmatprep.subr.mxu1 %v7163_v13 }
 0x427   :  { %6731 = vmatmul.mubr.msk.f32.vlgmr.msra.gmra.mrb[2].mxu0 %vm1454_vm2, %v2123_v55 }
 0x428   :  { %6739 = vmatpush3.msra.mxu0 %v1385_v21  ;;  %6721 = vmatmul.mubr.msk.f32.vlgmr.msra.gmra.mrb[24].mxu1 %vm1454_vm2, %v2121_v33 }
 0x429   :  { %6724 = vmatpush3.msra.mxu1 %v1451_v29  ;;  %6740 = vmatprep.mubr.msk.f32.mxu0 %vm7162_vm0, %v7163_v13 }
 0x42a   :  { %6725 = vmatprep.mubr.msk.f32.mxu1 %vm7162_vm0, %v7163_v13  ;;  %6733 = vmatprep.subr.mxu1 %v7163_v13 }
 0x42b   :  { %v7093_v12 = vpop.eup %7092 }
 0x42c   :  { %v2125_v19 = vmul.f32 %v7093_v12, %v7688_v25 }
 0x42e   :  { %6741 = vmatmul.mubr.msk.f32.vlgmr.msra.gmra.mrb[4].mxu0 %vm1454_vm2, %v2125_v19 }
 0x441   :  { %v2098_v23 = vpop.xlane.xlu1 %2097 }
 0x442   :  { %7094 = vrcp.f32 %v2098_v23 }
 0x443   :  { %7096 = vrcp.f32 %v2104_v37 }
 0x444   :  { %7098 = vrcp.f32 %v2110_v9 }
 0x44c   :  { %v7095_v10 = vpop.eup %7094 }
 0x44d   :  { %v2122_v21 = vmul.f32 %v7095_v10, %v7696_v52  ;;  %v7097_v50 = vpop.eup %7096 }
 0x44e   :  { %v2124_v45 = vmul.f32 %v7097_v50, %v7682_v20  ;;  %v7099_v15 = vpop.eup %7098 }
 0x44f   :  { %6726 = vmatmul.mubr.msk.f32.vlgmr.msra.gmra.mrb[26].mxu1 %vm1454_vm2, %v2122_v21  ;;  %v2126_v25 = vmul.f32 %v7099_v15, %v7692_v6 }
 0x450   :  { %6734 = vmatpush3.msra.mxu1 %v1452_v28  ;;  %6735 = vmatprep.mubr.msk.f32.mxu1 %vm7162_vm0, %v7163_v13 }
 0x451   :  { %6743 = vmatprep.subr.mxu1 %v7163_v13 }
 0x453   :  { %6736 = vmatmul.mubr.msk.f32.vlgmr.msra.gmra.mrb[28].mxu1 %vm1454_vm2, %v2124_v45 }
 0x454   :  { %6744 = vmatpush3.msra.mxu1 %v1453_v53  ;;  %6745 = vmatprep.mubr.msk.f32.mxu1 %vm7162_vm0, %v7163_v13 }
 0x457   :  { %6746 = vmatmul.mubr.msk.f32.vlgmr.msra.gmra.mrb[30].mxu1 %vm1454_vm2, %v2126_v25 }
 0x4e5   :  { %v2196_v52 = vpop.f32.mrb[20].mxu1 }
 0x4e6   :  { %v6712_v35 = vpop.f32.mrb[21].mxu1 }
 0x4f7   :  { %v2269_v38 = vpop.f32.mrb[22].mxu1 }
 0x4f8   :  { %v6717_v39 = vpop.f32.mrb[23].mxu1 }
 0x4fa   :  { %v2488_v40 = vpop.f32.mrb[2].mxu0 }
 0x4fb   :  { %v2711_v7 = vcombine.low %v2196_v52, %v2488_v40  ;;  %v2712_v20 = vcombine.high %v2196_v52, %v2488_v40  ;;  %v6732_v8 = vpop.f32.mrb[3].mxu0  ;;  %v2342_v26 = vpop.f32.mrb[24].mxu1 }
 0x4fc   :  { %v6722_v27 = vpop.f32.mrb[25].mxu1  ;;  %v465_v8 = vld [vmem:[%s8457_s3 + $0x48] sm:$0xff] }
 0x4fd   :  { %v2719_v41 = vrot.slane %v2711_v7, %v7235_v16  ;;  %v2726_v6 = vrot.slane %v2712_v20, %v7235_v16 }
 0x501   :  { %v2634_v14 = vpop.f32.mrb[4].mxu0 }
 0x502   :  { %v2727_v0 = vcombine.low %v2342_v26, %v2634_v14  ;;  %v2728_v1 = vcombine.high %v2342_v26, %v2634_v14  ;;  %v6742_v30 = vpop.f32.mrb[5].mxu0 }
 0x504   :  { %v2735_v57 = vrot.slane %v2727_v0, %v7235_v16  ;;  %v2742_v34 = vrot.slane %v2728_v1, %v7235_v16 }
 0x506   :  { %v2743_v43 = vcombine.low %v2719_v41, %v2735_v57  ;;  %v2744_v46 = vcombine.high %v2719_v41, %v2735_v57  ;;  %v2759_v48 = vcombine.low %v2726_v6, %v2742_v34  ;;  %v2760_v49 = vcombine.high %v2726_v6, %v2742_v34  ;;  %v466_v34 = vld [vmem:[%s8457_s3 + $0x50] sm:$0xff] }
 0x508   :  { %v2751_v51 = vrot.slane %v2743_v43, %v7419_v42  ;;  %v2758_v2 = vrot.slane %v2744_v46, %v7419_v42  ;;  %v2767_v3 = vrot.slane %v2759_v48, %v7419_v42  ;;  %v2774_v56 = vrot.slane %v2760_v49, %v7419_v42  ;;  %v467_v43 = vld [vmem:[%s8457_s3 + $0x58] sm:$0xff] }
 0x50a   :  { %v2847_v44 = vcombine.low %v2751_v51, %v2758_v2  ;;  %v6453_v36 = vcombine.high %v2751_v51, %v2758_v2  ;;  %v2863_v37 = vcombine.low %v2767_v3, %v2774_v56  ;;  %v6454_v58 = vcombine.high %v2767_v3, %v2774_v56 }
 0x50b   :  { %v6971_v2 = vpack.c.bf16 %v467_v43, %v466_v34 }
 0x50c   :  { %v2854_v59 = vrot.slane %v2847_v44, %v7235_v16  ;;  %v2862_v60 = vrot.slane %v6453_v36, %v7235_v16  ;;  %v2870_v61 = vrot.slane %v2863_v37, %v7235_v16  ;;  %v2878_v62 = vrot.slane %v6454_v58, %v7235_v16 }
 0x50e   :  { %v2879_v63 = vcombine.low %v2854_v59, %v2862_v60  ;;  %v2895_v4 = vcombine.low %v2870_v61, %v2878_v62  ;;  %v2880_v17 = vcombine.high %v2854_v59, %v2862_v60  ;;  %v2896_v18 = vcombine.high %v2870_v61, %v2878_v62 }
 0x510   :  { %v7774_v47 = vrot.slane %v2879_v63, %v7419_v42  ;;  %v7777_v5 = vrot.slane %v2895_v4, %v7419_v42  ;;  %v2894_v29 = vrot.slane %v2880_v17, %v7419_v42  ;;  %v2910_v31 = vrot.slane %v2896_v18, %v7419_v42 }
 0x512   :  { %v2912_v32 = vcombine.high %v7774_v47, %v7777_v5  ;;  %v2913_v28 = vcombine.low %v2894_v29, %v2910_v31  ;;  %v2914_v53 = vcombine.high %v2894_v29, %v2910_v31  ;;  %v2911_v54 = vcombine.low %v7774_v47, %v7777_v5  ;;  %v7836_v5 = vld [vmem:[%s8459_s4] sm:$0xff] }
 0x513   :  { %v7831_v47 = vsub.s32 1, %v7229_v11 }
 0x514   :  { %2985 = vrot.lane.b32.xlu0 %v2912_v32, %s7176_s16 }
 0x518   :  { %2993 = vrot.lane.b32.xlu0 %v2913_v28, %s7177_s17 }
 0x51c   :  { %3001 = vrot.lane.b32.xlu0 %v2914_v53, %s7178_s18 }
 0x522   :  { %v2415_v55 = vpop.f32.mrb[26].mxu1 }
 0x523   :  { %v6727_v33 = vpop.f32.mrb[27].mxu1 }
 0x526   :  { %v2561_v12 = vpop.f32.mrb[28].mxu1 }
 0x527   :  { %v2779_v19 = vcombine.low %v2269_v38, %v2561_v12  ;;  %v2780_v23 = vcombine.high %v2269_v38, %v2561_v12  ;;  %v6737_v9 = vpop.f32.mrb[29].mxu1  ;;  %v464_v38 = vld [vmem:[%s8457_s3 + $0x40] sm:$0xff] }
 0x528   :  { %v6967_v1 = vpack.c.bf16 %v465_v8, %v464_v38 }
 0x529   :  { %v2787_v15 = vrot.slane %v2779_v19, %v7235_v16  ;;  %v2794_v25 = vrot.slane %v2780_v23, %v7235_v16 }
 0x52a   :  { %v2707_v10 = vpop.f32.mrb[30].mxu1  ;;  %6968 = vmatprep.subr.bf16.mxu1 %v6967_v1 }
 0x52b   :  { %v2795_v21 = vcombine.low %v2415_v55, %v2707_v10  ;;  %v2796_v50 = vcombine.high %v2415_v55, %v2707_v10  ;;  %v6747_v45 = vpop.f32.mrb[31].mxu1  ;;  %6970 = vmatpush3.bf16.msra.mxu1 %v6967_v1 }
 0x52c   :  { %6972 = vmatprep.subr.bf16.mxu1 %v6971_v2  ;;  %v7157_v45 = vld [vmem:[%s8458_s1 + $0x8] sm:$0xff] }
 0x52d   :  { %v2803_v52 = vrot.slane %v2795_v21, %v7235_v16  ;;  %v2810_v35 = vrot.slane %v2796_v50, %v7235_v16 }
 0x52f   :  { %v2811_v39 = vcombine.low %v2787_v15, %v2803_v52  ;;  %v2812_v40 = vcombine.high %v2787_v15, %v2803_v52  ;;  %v2827_v7 = vcombine.low %v2794_v25, %v2810_v35  ;;  %v2828_v20 = vcombine.high %v2794_v25, %v2810_v35  ;;  %6974 = vmatpush3.bf16.msra.mxu1 %v6971_v2  ;;  %v7158_v25 = vld [vmem:[%s8458_s1] sm:$0xff] }
 0x531   :  { %v2819_v26 = vrot.slane %v2811_v39, %v7419_v42  ;;  %v2826_v27 = vrot.slane %v2812_v40, %v7419_v42  ;;  %v2835_v14 = vrot.slane %v2827_v7, %v7419_v42  ;;  %v2842_v0 = vrot.slane %v2828_v20, %v7419_v42 }
 0x533   :  { %v2915_v30 = vcombine.low %v2819_v26, %v2826_v27  ;;  %v6455_v41 = vcombine.high %v2819_v26, %v2826_v27  ;;  %v2931_v6 = vcombine.low %v2835_v14, %v2842_v0  ;;  %v6456_v57 = vcombine.high %v2835_v14, %v2842_v0 }
 0x535   :  { %v2922_v46 = vrot.slane %v2915_v30, %v7235_v16  ;;  %v2930_v48 = vrot.slane %v6455_v41, %v7235_v16  ;;  %v2938_v49 = vrot.slane %v2931_v6, %v7235_v16  ;;  %v2946_v51 = vrot.slane %v6456_v57, %v7235_v16 }
 0x536   :  { %v7851_v30 = vsub.s32 2, %v7229_v11  ;;  %v7179_v41 = vmov 1966171168  }
 0x537   :  { %v2947_v3 = vcombine.low %v2922_v46, %v2930_v48  ;;  %v2963_v56 = vcombine.low %v2938_v49, %v2946_v51  ;;  %v2948_v44 = vcombine.high %v2922_v46, %v2930_v48  ;;  %v2964_v36 = vcombine.high %v2938_v49, %v2946_v51 }
 0x538   :  { %v3143_v6 = vunpack.c.l.s4 %v7179_v41  ;;  %v483_v46 = vrot.slane %v7836_v5, %v7851_v30 }
 0x539   :  { %v2955_v37 = vrot.slane %v2947_v3, %v7419_v42  ;;  %v2971_v58 = vrot.slane %v2963_v56, %v7419_v42  ;;  %v2962_v59 = vrot.slane %v2948_v44, %v7419_v42  ;;  %v2978_v60 = vrot.slane %v2964_v36, %v7419_v42 }
 0x53a   :  { %v3144_v48 = vunpack.c.0.s8 %v3143_v6  ;;  %v484_v3 = vadd.f32 %v483_v46, %v7363_v22  ;;  %v3131_v44 = vsub.s32 5, %v7229_v11  ;;  %v476_v6 = vld [vmem:[%s8457_s3 + $0x100] sm:$0xff] }
 0x53b   :  { %v2980_v61 = vcombine.high %v2955_v37, %v2971_v58  ;;  %v2981_v62 = vcombine.low %v2962_v59, %v2978_v60  ;;  %v2982_v63 = vcombine.high %v2962_v59, %v2978_v60  ;;  %v2979_v4 = vcombine.low %v2955_v37, %v2971_v58 }
 0x53c   :  { %v7857_v56 = vsub.s32 %v3144_v48, %v7229_v11  ;;  %v3137_v37 = vsub.s32 6, %v7229_v11  ;;  %v3132_v58 = vrot.slane %v7836_v5, %v3131_v44 }
 0x53d   :  { %2987 = vrot.lane.b32.xlu1 %v2980_v61, %s7176_s16 }
 0x53e   :  { %v3148_v36 = vrot.slane %v484_v3, %v7857_v56  ;;  %v3204_v3 = vsub.s32 7, %v7229_v11 }
 0x540   :  { %v3149_v60 = vcombine.high %v3148_v36, %v3148_v36  ;;  %v3156_v61 = vrot.slane %v3148_v36, %v7857_v56  ;;  %v7910_v36 = vld [vmem:[%s8459_s4 + $0x8] sm:$0xff] }
 0x541   :  { %2995 = vrot.lane.b32.xlu1 %v2981_v62, %s7177_s17 }
 0x545   :  { %3003 = vrot.lane.b32.xlu1 %v2982_v63, %s7178_s18  ;;  %v3138_v63 = vrot.slane %v7836_v5, %v3137_v37 }
 0x586   :  { %v2986_v17 = vpop.permute.xlu0 %2985 }
 0x587   :  { %v3007_v29 = vsel %vm1454_vm2, %v2911_v54, %v2986_v17  ;;  %v3018_v54 = vrot.slane %v7836_v5, %v7831_v47 }
 0x58a   :  { %v2994_v18 = vpop.permute.xlu0 %2993 }
 0x58b   :  { %v3010_v31 = vsel %vm3009_vm3, %v3007_v29, %v2994_v18  ;;  %v3167_v29 = vrot.slane %v3156_v61, %v7366_v24  ;;  %v3211_v61 = vrot.slane %v7910_v36, %v7366_v24 }
 0x58e   :  { %v3002_v32 = vpop.permute.xlu0 %3001 }
 0x58f   :  { %v3013_v28 = vsel %vm3012_vm4, %v3010_v31, %v3002_v32  ;;  %v3163_v32 = vrot.slane %v3149_v60, %v7857_v56 }
 0x590   :  { %6756 = vmatprep.mubr.msk.f32.mxu1 %vm382_vm1, %v3013_v28 }
 0x5af   :  { %v2988_v53 = vpop.permute.xlu1 %2987 }
 0x5b0   :  { %v3008_v33 = vsel %vm1454_vm2, %v2979_v4, %v2988_v53 }
 0x5b3   :  { %v2996_v55 = vpop.permute.xlu1 %2995 }
 0x5b4   :  { %v3011_v12 = vsel %vm3009_vm3, %v3008_v33, %v2996_v55 }
 0x5b7   :  { %v3004_v19 = vpop.permute.xlu1 %3003 }
 0x5b8   :  { %v3014_v23 = vsel %vm3012_vm4, %v3011_v12, %v3004_v19  ;;  %v3171_v12 = vrot.slane %v3163_v32, %v7366_v24  ;;  %v479_v32 = vld [vmem:[%s8457_s3 + $0x118] sm:$0xff] }
 0x5b9   :  { %6757 = vmatmul.mubr.msk.f32.vlgmr.msra.gmra.mrb[32].mxu1 %vm382_vm1, %v3014_v23 }
 0x68c   :  { %v6758_v9 = vpop.f32.mrb[32].mxu1 }
 0x68d   :  { %v3097_v10 = vadd.f32 %v6758_v9, %v3018_v54  ;;  %v3091_v21 = vpop.f32.mrb[33].mxu1 }
 0x68e   :  { %v3092_v50 = vadd.f32 %v3091_v21, %v3018_v54 }
 0x68f   :  { %v3101_v15 = vadd.f32 %v7157_v45, %v3097_v10 }
 0x690   :  { %v3100_v52 = vadd.f32 %v7158_v25, %v3092_v50 }
 0x691   :  { %v3105_v35 = vsel %vm382_vm1, %v3101_v15, 0.0 }
 0x692   :  { %3106 = vadd.xlane.f32.xlu1 %v3105_v35  ;;  %v3102_v39 = vsel %vm382_vm1, %v3100_v52, 0.0 }
 0x693   :  { %3103 = vadd.xlane.f32.xlu0 %v3102_v39  ;;  %v468_v39 = vld [vmem:[%s8457_s3 + $0xa0] sm:$0xff] }
 0x71f   :  { %v3107_v40 = vpop.xlane.xlu1 %3106 }
 0x720   :  { %v3110_v7 = vmul.f32 0.03125, %v3107_v40  ;;  %v3104_v20 = vpop.xlane.xlu0 %3103  ;;  %v469_v40 = vld [vmem:[%s8457_s3 + $0xa8] sm:$0xff] }
 0x721   :  { %v3109_v38 = vmul.f32 0.03125, %v3104_v20  ;;  %v6975_v20 = vpack.c.bf16 %v469_v40, %v468_v39 }
 0x722   :  { %v3112_v8 = vsub.f32 %v3101_v15, %v3110_v7  ;;  %v470_v7 = vld [vmem:[%s8457_s3 + $0xb0] sm:$0xff] }
 0x723   :  { %v3111_v26 = vsub.f32 %v3100_v52, %v3109_v38  ;;  %v471_v38 = vld [vmem:[%s8457_s3 + $0xb8] sm:$0xff]  ;;  %6976 = vmatprep.subr.bf16.mxu1 %v6975_v20 }
 0x724   :  { %v3114_v0 = vmul.f32 %v3112_v8, %v3112_v8  ;;  %6978 = vmatpush3.bf16.msra.mxu1 %v6975_v20 }
 0x725   :  { %v3113_v27 = vmul.f32 %v3111_v26, %v3111_v26 }
 0x726   :  { %v3118_v1 = vsel %vm382_vm1, %v3114_v0, 0.0 }
 0x727   :  { %v3115_v14 = vsel %vm382_vm1, %v3113_v27, 0.0  ;;  %v473_v27 = vld [vmem:[%s8457_s3 + $0xe8] sm:$0xff] }
 0x728   :  { %3116 = vadd.xlane.f32.xlu0 %v3115_v14  ;;  %v474_v14 = vld [vmem:[%s8457_s3 + $0xf0] sm:$0xff] }
 0x72c   :  { %3119 = vadd.xlane.f32.xlu0 %v3118_v1  ;;  %v475_v1 = vld [vmem:[%s8457_s3 + $0xf8] sm:$0xff] }
 0x72d   :  { %v6987_v41 = vpack.c.bf16 %v475_v1, %v474_v14 }
 0x7b5   :  { %v3117_v57 = vpop.xlane.xlu0 %3116 }
 0x7b6   :  { %v3121_v34 = vmul.f32 0.03125, %v3117_v57  ;;  %v477_v57 = vld [vmem:[%s8457_s3 + $0x108] sm:$0xff] }
 0x7b8   :  { %v3123_v43 = vadd.f32 1e-05, %v3121_v34  ;;  %v6991_v34 = vpack.c.bf16 %v477_v57, %v476_v6  ;;  %v3431_v6 = vld [vmem:[%s8457_s3 + $0x28] sm:$0xff]  ;;  %v3432_v57 = vld [vmem:[%s8457_s3 + $0x30] sm:$0xff] }
 0x7b9   :  { %v3120_v49 = vpop.xlane.xlu0 %3119 }
 0x7ba   :  { %7100 = vrsqrt.f32 %v3123_v43  ;;  %v3122_v51 = vmul.f32 0.03125, %v3120_v49 }
 0x7bc   :  { %v3124_v2 = vadd.f32 1e-05, %v3122_v51 }
 0x7be   :  { %7102 = vrsqrt.f32 %v3124_v2 }
 0x7c4   :  { %v7101_v59 = vpop.eup %7100 }
 0x7c5   :  { %v3127_v62 = vmul.f32 %v7101_v59, %v3111_v26  ;;  %v472_v26 = vld [vmem:[%s8457_s3 + $0xe0] sm:$0xff] }
 0x7c6   :  { %v6983_v0 = vpack.c.bf16 %v473_v27, %v472_v26 }
 0x7c7   :  { %v3133_v4 = vmul.f32 %v3132_v58, %v3127_v62 }
 0x7c8   :  { %v7103_v17 = vpop.eup %7102  ;;  %6984 = vmatprep.subr.bf16.mxu0 %v6983_v0 }
 0x7c9   :  { %v3139_v18 = vadd.f32 %v3138_v63, %v3133_v4  ;;  %v3128_v31 = vmul.f32 %v7103_v17, %v3112_v8  ;;  %v6979_v8 = vpack.c.bf16 %v471_v38, %v470_v7  ;;  %6986 = vmatpush3.bf16.msra.mxu0 %v6983_v0 }
 0x7ca   :  { %6988 = vmatprep.subr.bf16.mxu0 %v6987_v41 }
 0x7cb   :  { %v3174_v28 = vadd.f32 %v3167_v29, %v3139_v18  ;;  %v3134_v53 = vmul.f32 %v3132_v58, %v3128_v31  ;;  %6980 = vmatprep.subr.bf16.mxu1 %v6979_v8  ;;  %v3205_v58 = vrot.slane %v7836_v5, %v3204_v3  ;;  %v478_v31 = vld [vmem:[%s8457_s3 + $0x110] sm:$0xff] }
 0x7cc   :  { %6982 = vmatpush3.bf16.msra.mxu1 %v6979_v8 }
 0x7cd   :  { %v3176_v55 = vsel %vm382_vm1, %v3174_v28, 0.0  ;;  %v3140_v33 = vadd.f32 %v3138_v63, %v3134_v53  ;;  %6990 = vmatpush3.bf16.msra.mxu0 %v6987_v41  ;;  %v3216_v53 = vsub.s32 3, %v7229_v11  ;;  %v3430_v41 = vld [vmem:[%s8457_s3 + $0x20] sm:$0xff] }
 0x7ce   :  { %3177 = vadd.xlane.f32.xlu1 %v3176_v55  ;;  %6992 = vmatprep.subr.bf16.mxu0 %v6991_v34 }
 0x7cf   :  { %v3175_v19 = vadd.f32 %v3171_v12, %v3140_v33  ;;  %v3217_v55 = vrot.slane %v7836_v5, %v3216_v53 }
 0x7d1   :  { %v3179_v23 = vsel %vm382_vm1, %v3175_v19, 0.0  ;;  %6994 = vmatpush3.bf16.msra.mxu0 %v6991_v34  ;;  %v6999_v34 = vpack.c.bf16 %v3431_v6, %v3430_v41 }
 0x7d2   :  { %3180 = vadd.xlane.f32.xlu0 %v3179_v23 }
 0x7d3   :  { %7000 = vmatprep.subr.bf16.mxu1 %v6999_v34 }
 0x85b   :  { %v3178_v54 = vpop.xlane.xlu1 %3177 }
 0x85c   :  { %v3182_v9 = vmul.f32 0.03125, %v3178_v54 }
 0x85e   :  { %v3184_v10 = vsub.f32 %v3174_v28, %v3182_v9  ;;  %v6995_v28 = vpack.c.bf16 %v479_v32, %v478_v31 }
 0x85f   :  { %v3181_v21 = vpop.xlane.xlu0 %3180 }
 0x860   :  { %v3183_v50 = vmul.f32 0.03125, %v3181_v21  ;;  %v3186_v45 = vmul.f32 %v3184_v10, %v3184_v10  ;;  %6996 = vmatprep.subr.bf16.mxu0 %v6995_v28 }
 0x861   :  { %6998 = vmatpush3.bf16.msra.mxu0 %v6995_v28  ;;  %v6463_v28 = vld [vmem:[%s8459_s4 + $0x10] sm:$0xff] }
 0x862   :  { %v3185_v15 = vsub.f32 %v3175_v19, %v3183_v50  ;;  %v3188_v25 = vsel %vm382_vm1, %v3186_v45, 0.0  ;;  %6810 = vmatprep.subr.mxu0 %v7163_v13 }
 0x863   :  { %3189 = vadd.xlane.f32.xlu1 %v3188_v25 }
 0x864   :  { %v3187_v52 = vmul.f32 %v3185_v15, %v3185_v15 }
 0x866   :  { %v3191_v35 = vsel %vm382_vm1, %v3187_v52, 0.0 }
 0x867   :  { %3192 = vadd.xlane.f32.xlu0 %v3191_v35 }
 0x8f0   :  { %v3190_v43 = vpop.xlane.xlu1 %3189 }
 0x8f1   :  { %v3194_v46 = vmul.f32 0.03125, %v3190_v43  ;;  %v3433_v43 = vld [vmem:[%s8457_s3 + $0x38] sm:$0xff] }
 0x8f3   :  { %v3196_v48 = vadd.f32 1e-05, %v3194_v46  ;;  %v7003_v46 = vpack.c.bf16 %v3433_v43, %v3432_v57 }
 0x8f4   :  { %v3193_v49 = vpop.xlane.xlu0 %3192 }
 0x8f5   :  { %7104 = vrsqrt.f32 %v3196_v48  ;;  %v3195_v51 = vmul.f32 0.03125, %v3193_v49 }
 0x8f7   :  { %v3197_v2 = vadd.f32 1e-05, %v3195_v51 }
 0x8f9   :  { %7106 = vrsqrt.f32 %v3197_v2 }
 0x8ff   :  { %v7105_v59 = vpop.eup %7104 }
 0x900   :  { %v3200_v60 = vmul.f32 %v7105_v59, %v3184_v10  ;;  %v3303_v10 = vsub.s32 4, %v7229_v11 }
 0x902   :  { %v3206_v62 = vmul.f32 %v3205_v58, %v3200_v60  ;;  %v3304_v21 = vrot.slane %v7836_v5, %v3303_v10  ;;  %v3418_v60 = vrot.slane %v7910_v36, %v7831_v47 }
 0x903   :  { %v7107_v63 = vpop.eup %7106 }
 0x904   :  { %v3201_v4 = vmul.f32 %v7107_v63, %v3185_v15  ;;  %v3212_v17 = vadd.f32 %v3211_v61, %v3206_v62 }
 0x906   :  { %v3207_v18 = vmul.f32 %v3205_v58, %v3201_v4  ;;  %6767 = vmatprep.mubr.msk.f32.mxu1 %vm382_vm1, %v3212_v17 }
 0x908   :  { %v3213_v29 = vadd.f32 %v3211_v61, %v3207_v18 }
 0x90a   :  { %6768 = vmatmul.mubr.msk.f32.vlgmr.msra.gmra.mrb[34].mxu1 %vm382_vm1, %v3213_v29 }
 0x90b   :  { %7002 = vmatpush3.bf16.msra.mxu1 %v6999_v34 }
 0x90c   :  { %7004 = vmatprep.subr.bf16.mxu1 %v7003_v46 }
 0x90f   :  { %7006 = vmatpush3.bf16.msra.mxu1 %v7003_v46 }
 0x910   :  { %6800 = vmatprep.subr.mxu1 %v7163_v13 }
 0x9dd   :  { %v6769_v33 = vpop.f32.mrb[34].mxu1 }
 0x9de   :  { %v3296_v12 = vadd.f32 %v6769_v33, %v3217_v55  ;;  %v3290_v19 = vpop.f32.mrb[35].mxu1 }
 0x9df   :  { %v3291_v23 = vadd.f32 %v3290_v19, %v3217_v55 }
 0x9e0   :  { %v3300_v9 = vmax.f32 %v3296_v12, 0.0 }
 0x9e1   :  { %v3299_v54 = vmax.f32 %v3291_v23, 0.0 }
 0x9e3   :  { %6786 = vmatprep.mubr.msk.f32.mxu0 %vm3305_vm5, %v3299_v54 }
 0x9e4   :  { %6787 = vmatmul.mubr.msk.f32.vlgmr.msra.gmra.mrb[6].mxu0 %vm3305_vm5, %v3300_v9 }
 0x9e5   :  { %6812 = vmatprep.mubr.msk.f32.mxu0 %vm7162_vm0, %v7163_v13 }
 0xab7   :  { %v6788_v50 = vpop.f32.mrb[6].mxu0 }
 0xab8   :  { %v3384_v45 = vadd.f32 %v6788_v50, %v3304_v21  ;;  %v3378_v15 = vpop.f32.mrb[7].mxu0 }
 0xab9   :  { %v3379_v25 = vadd.f32 %v3378_v15, %v3304_v21 }
 0xaba   :  { %v3388_v52 = vadd.f32 %v3384_v45, %v3213_v29 }
 0xabb   :  { %v3387_v35 = vadd.f32 %v3379_v25, %v3212_v17  ;;  %v3424_v17 = vrot.slane %v7910_v36, %v7851_v30  ;;  %v3462_v36 = vrot.slane %v6463_v28, %v7366_v24 }
 0xabc   :  { %v3392_v39 = vsel %vm382_vm1, %v3388_v52, 0.0 }
 0xabd   :  { %3393 = vadd.xlane.f32.xlu0 %v3392_v39  ;;  %v3389_v40 = vsel %vm382_vm1, %v3387_v35, 0.0 }
 0xabe   :  { %3390 = vadd.xlane.f32.xlu1 %v3389_v40 }
 0xb4a   :  { %v3394_v7 = vpop.xlane.xlu0 %3393 }
 0xb4b   :  { %v3396_v20 = vmul.f32 0.03125, %v3394_v7  ;;  %v3391_v38 = vpop.xlane.xlu1 %3390 }
 0xb4c   :  { %v3395_v8 = vmul.f32 0.03125, %v3391_v38 }
 0xb4d   :  { %v3398_v26 = vsub.f32 %v3388_v52, %v3396_v20 }
 0xb4e   :  { %v3397_v27 = vsub.f32 %v3387_v35, %v3395_v8 }
 0xb4f   :  { %v3400_v14 = vmul.f32 %v3398_v26, %v3398_v26 }
 0xb50   :  { %v3399_v5 = vmul.f32 %v3397_v27, %v3397_v27 }
 0xb51   :  { %v3404_v0 = vsel %vm382_vm1, %v3400_v14, 0.0 }
 0xb52   :  { %3405 = vadd.xlane.f32.xlu0 %v3404_v0  ;;  %v3401_v1 = vsel %vm382_vm1, %v3399_v5, 0.0 }
 0xb53   :  { %3402 = vadd.xlane.f32.xlu1 %v3401_v1 }
 0xbdf   :  { %v3406_v48 = vpop.xlane.xlu0 %3405 }
 0xbe0   :  { %v3408_v49 = vmul.f32 0.03125, %v3406_v48  ;;  %v3403_v51 = vpop.xlane.xlu1 %3402 }
 0xbe1   :  { %v3407_v2 = vmul.f32 0.03125, %v3403_v51 }
 0xbe2   :  { %v3410_v58 = vadd.f32 1e-05, %v3408_v49 }
 0xbe3   :  { %v3409_v59 = vadd.f32 1e-05, %v3407_v2 }
 0xbe4   :  { %7108 = vrsqrt.f32 %v3410_v58 }
 0xbe5   :  { %7110 = vrsqrt.f32 %v3409_v59 }
 0xbee   :  { %v7109_v61 = vpop.eup %7108 }
 0xbef   :  { %v7111_v62 = vpop.eup %7110  ;;  %v3414_v63 = vmul.f32 %v7109_v61, %v3398_v26 }
 0xbf0   :  { %v3413_v4 = vmul.f32 %v7111_v62, %v3397_v27 }
 0xbf1   :  { %v3420_v18 = vmul.f32 %v3418_v60, %v3414_v63 }
 0xbf2   :  { %v3419_v29 = vmul.f32 %v3418_v60, %v3413_v4 }
 0xbf3   :  { %v7961_v32 = vadd.f32 %v3424_v17, %v3420_v18 }
 0xbf4   :  { %v7959_v31 = vadd.f32 %v3424_v17, %v3419_v29 }
 0xbf6   :  { %6797 = vmatprep.mubr.msk.f32.mxu1 %vm382_vm1, %v7959_v31 }
 0xbf7   :  { %6798 = vmatmul.mubr.msk.f32.vlgmr.msra.gmra.mrb[36].mxu1 %vm382_vm1, %v7961_v32 }
 0xbf8   :  { %6802 = vmatprep.mubr.msk.f32.mxu1 %vm7162_vm0, %v7163_v13 }
 0xcca   :  { %v6799_v55 = vpop.f32.mrb[36].mxu1 }
 0xccb   :  { %v7973_v33 = vadd.f32 %v6799_v55, %v3462_v36  ;;  %v3535_v12 = vpop.f32.mrb[37].mxu1 }
 0xccc   :  { %v7983_v19 = vadd.f32 %v3535_v12, %v3462_v36 }
 0xccd   :  { %3572 = vrot.lane.b32.xlu0 %v7973_v33, %s7164_s30  ;;  %3566 = vrot.lane.b32.xlu1 %v7973_v33, %s7165_s6 }
 0xcd1   :  { %3584 = vrot.lane.b32.xlu0 %v7973_v33, %s7166_s7  ;;  %3578 = vrot.lane.b32.xlu1 %v7973_v33, %s7167_s8 }
 0xcd5   :  { %3548 = vrot.lane.b32.xlu1 %v7973_v33, %s7168_s9  ;;  %3570 = vrot.lane.b32.xlu0 %v7983_v19, %s7164_s30 }
 0xcd9   :  { %3546 = vrot.lane.b32.xlu0 %v7983_v19, %s7168_s9  ;;  %3564 = vrot.lane.b32.xlu1 %v7983_v19, %s7165_s6 }
 0xcdd   :  { %3558 = vrot.lane.b32.xlu0 %v7983_v19, %s7170_s11  ;;  %3576 = vrot.lane.b32.xlu1 %v7983_v19, %s7167_s8 }
 0xce1   :  { %3554 = vrot.lane.b32.xlu0 %v7973_v33, %s7169_s10  ;;  %3582 = vrot.lane.b32.xlu1 %v7983_v19, %s7166_s7 }
 0xce5   :  { %3594 = vrot.lane.b32.xlu0 %v7983_v19, %s7172_s13  ;;  %3552 = vrot.lane.b32.xlu1 %v7983_v19, %s7169_s10 }
 0xce9   :  { %3560 = vrot.lane.b32.xlu1 %v7973_v33, %s7170_s11 }
 0xced   :  { %3590 = vrot.lane.b32.xlu1 %v7973_v33, %s7171_s12 }
 0xcf1   :  { %3596 = vrot.lane.b32.xlu1 %v7973_v33, %s7172_s13 }
 0xcf5   :  { %3602 = vrot.lane.b32.xlu1 %v7973_v33, %s7173_s14 }
 0xcf9   :  { %3588 = vrot.lane.b32.xlu1 %v7983_v19, %s7171_s12 }
 0xcfd   :  { %3600 = vrot.lane.b32.xlu1 %v7983_v19, %s7173_s14 }
 0xd01   :  { %3606 = vrot.lane.b32.xlu1 %v7983_v19, %s7174_s15 }
 0xd3f   :  { %v3573_v23 = vpop.permute.xlu0 %3572  ;;  %v3567_v54 = vpop.permute.xlu1 %3566 }
 0xd43   :  { %v3585_v9 = vpop.permute.xlu0 %3584  ;;  %v3579_v21 = vpop.permute.xlu1 %3578 }
 0xd44   :  { %v3864_v50 = vcombine.low %v3573_v23, %v3585_v9  ;;  %v3865_v45 = vcombine.high %v3573_v23, %v3585_v9  ;;  %v3848_v15 = vcombine.low %v3567_v54, %v3579_v21  ;;  %v3849_v25 = vcombine.high %v3567_v54, %v3579_v21 }
 0xd46   :  { %v3872_v52 = vrot.slane %v3864_v50, %v7235_v16  ;;  %v3879_v35 = vrot.slane %v3865_v45, %v7235_v16  ;;  %v3856_v39 = vrot.slane %v3848_v15, %v7235_v16  ;;  %v3863_v40 = vrot.slane %v3849_v25, %v7235_v16 }
 0xd47   :  { %v8023_v7 = vpop.permute.xlu1 %3548  ;;  %v3571_v20 = vpop.permute.xlu0 %3570 }
 0xd48   :  { %v3912_v38 = vcombine.low %v3856_v39, %v3872_v52  ;;  %v3913_v8 = vcombine.high %v3856_v39, %v3872_v52  ;;  %v3928_v26 = vcombine.low %v3863_v40, %v3879_v35  ;;  %v3929_v27 = vcombine.high %v3863_v40, %v3879_v35 }
 0xd4a   :  { %v3920_v14 = vrot.slane %v3912_v38, %v7419_v42  ;;  %v3927_v5 = vrot.slane %v3913_v8, %v7419_v42  ;;  %v3936_v0 = vrot.slane %v3928_v26, %v7419_v42  ;;  %v3943_v1 = vrot.slane %v3929_v27, %v7419_v42 }
 0xd4b   :  { %v3547_v41 = vpop.permute.xlu0 %3546  ;;  %v3565_v6 = vpop.permute.xlu1 %3564 }
 0xd4c   :  { %v6476_v57 = vcombine.low %v3920_v14, %v3927_v5  ;;  %v6478_v34 = vcombine.high %v3920_v14, %v3927_v5  ;;  %v6480_v43 = vcombine.low %v3936_v0, %v3943_v1  ;;  %v6482_v46 = vcombine.high %v3936_v0, %v3943_v1 }
 0xd4e   :  { %v8030_v48 = vrot.slane %v6476_v57, %v7235_v16  ;;  %v8033_v49 = vrot.slane %v6478_v34, %v7235_v16  ;;  %v8036_v51 = vrot.slane %v6480_v43, %v7235_v16  ;;  %v8039_v2 = vrot.slane %v6482_v46, %v7235_v16 }
 0xd4f   :  { %v3559_v58 = vpop.permute.xlu0 %3558  ;;  %v3577_v59 = vpop.permute.xlu1 %3576 }
 0xd50   :  { %v4236_v60 = vcombine.low %v8030_v48, %v8033_v49  ;;  %v4268_v61 = vcombine.low %v8036_v51, %v8039_v2  ;;  %v3644_v62 = vcombine.low %v3565_v6, %v3577_v59  ;;  %v3645_v63 = vcombine.high %v3565_v6, %v3577_v59 }
 0xd51   :  { %v3628_v4 = vcombine.low %v3547_v41, %v3559_v58  ;;  %v3629_v36 = vcombine.high %v3547_v41, %v3559_v58 }
 0xd52   :  { %v8046_v55 = vrot.slane %v4236_v60, %v7419_v42  ;;  %v8049_v12 = vrot.slane %v4268_v61, %v7419_v42  ;;  %v3652_v23 = vrot.slane %v3644_v62, %v7235_v16  ;;  %v3659_v54 = vrot.slane %v3645_v63, %v7235_v16 }
 0xd53   :  { %v3583_v17 = vpop.permute.xlu1 %3582  ;;  %v3555_v18 = vpop.permute.xlu0 %3554  ;;  %v3636_v50 = vrot.slane %v3628_v4, %v7235_v16 }
 0xd54   :  { %v3660_v29 = vcombine.low %v3571_v20, %v3583_v17  ;;  %v3661_v28 = vcombine.high %v3571_v20, %v3583_v17  ;;  %v3816_v45 = vcombine.low %v7973_v33, %v3555_v18  ;;  %v3817_v15 = vcombine.high %v7973_v33, %v3555_v18 }
 0xd55   :  { %v3643_v20 = vrot.slane %v3629_v36, %v7235_v16  ;;  %v4288_v26 = vcombine.low %v8046_v55, %v8049_v12 }
 0xd56   :  { %v3668_v9 = vrot.slane %v3660_v29, %v7235_v16  ;;  %v3675_v21 = vrot.slane %v3661_v28, %v7235_v16  ;;  %v3824_v1 = vrot.slane %v3816_v45, %v7235_v16  ;;  %v3831_v41 = vrot.slane %v3817_v15, %v7235_v16 }
 0xd57   :  { %v3553_v25 = vpop.permute.xlu1 %3552 }
 0xd58   :  { %v3708_v52 = vcombine.low %v3652_v23, %v3668_v9  ;;  %v3709_v35 = vcombine.high %v3652_v23, %v3668_v9  ;;  %v3724_v39 = vcombine.low %v3659_v54, %v3675_v21  ;;  %v3725_v40 = vcombine.high %v3659_v54, %v3675_v21 }
 0xd59   :  { %v3612_v38 = vcombine.low %v7983_v19, %v3553_v25  ;;  %v3613_v8 = vcombine.high %v7983_v19, %v3553_v25 }
 0xd5a   :  { %v3716_v27 = vrot.slane %v3708_v52, %v7419_v42  ;;  %v3723_v14 = vrot.slane %v3709_v35, %v7419_v42  ;;  %v3732_v5 = vrot.slane %v3724_v39, %v7419_v42  ;;  %v3739_v0 = vrot.slane %v3725_v40, %v7419_v42 }
 0xd5b   :  { %v3620_v6 = vrot.slane %v3612_v38, %v7235_v16  ;;  %v3627_v57 = vrot.slane %v3613_v8, %v7235_v16  ;;  %v3561_v19 = vpop.permute.xlu1 %3560 }
 0xd5c   :  { %v6468_v34 = vcombine.low %v3716_v27, %v3723_v14  ;;  %v6470_v43 = vcombine.high %v3716_v27, %v3723_v14  ;;  %v6472_v46 = vcombine.low %v3732_v5, %v3739_v0  ;;  %v6474_v58 = vcombine.high %v3732_v5, %v3739_v0 }
 0xd5d   :  { %v3676_v59 = vcombine.low %v3620_v6, %v3636_v50  ;;  %v3677_v60 = vcombine.high %v3620_v6, %v3636_v50  ;;  %v3692_v61 = vcombine.low %v3627_v57, %v3643_v20  ;;  %v3693_v62 = vcombine.high %v3627_v57, %v3643_v20 }
 0xd5e   :  { %v4035_v63 = vrot.slane %v6468_v34, %v7235_v16  ;;  %v4051_v4 = vrot.slane %v6470_v43, %v7235_v16  ;;  %v4067_v17 = vrot.slane %v6472_v46, %v7235_v16  ;;  %v4083_v18 = vrot.slane %v6474_v58, %v7235_v16 }
 0xd5f   :  { %v3684_v29 = vrot.slane %v3676_v59, %v7419_v42  ;;  %v3691_v28 = vrot.slane %v3677_v60, %v7419_v42  ;;  %v3700_v36 = vrot.slane %v3692_v61, %v7419_v42  ;;  %v3707_v23 = vrot.slane %v3693_v62, %v7419_v42  ;;  %v8079_v54 = vpop.permute.xlu1 %3590 }
 0xd60   :  { %v4100_v9 = vcombine.low %v4035_v63, %v4051_v4  ;;  %v4101_v21 = vcombine.high %v4035_v63, %v4051_v4  ;;  %v4132_v50 = vcombine.low %v4067_v17, %v4083_v18  ;;  %v4133_v45 = vcombine.high %v4067_v17, %v4083_v18 }
 0xd61   :  { %v6467_v15 = vcombine.low %v3684_v29, %v3691_v28  ;;  %v6469_v25 = vcombine.high %v3684_v29, %v3691_v28  ;;  %v6471_v52 = vcombine.low %v3700_v36, %v3707_v23  ;;  %v6473_v35 = vcombine.high %v3700_v36, %v3707_v23 }
 0xd62   :  { %v3832_v39 = vcombine.low %v8023_v7, %v3561_v19  ;;  %v3833_v40 = vcombine.high %v8023_v7, %v3561_v19  ;;  %v4108_v20 = vrot.slane %v4100_v9, %v7419_v42  ;;  %v4140_v38 = vrot.slane %v4132_v50, %v7419_v42 }
 0xd63   :  { %v4028_v8 = vrot.slane %v6467_v15, %v7235_v16  ;;  %v4044_v27 = vrot.slane %v6469_v25, %v7235_v16  ;;  %v4060_v14 = vrot.slane %v6471_v52, %v7235_v16  ;;  %v4076_v5 = vrot.slane %v6473_v35, %v7235_v16  ;;  %v8089_v0 = vpop.permute.xlu1 %3596 }
 0xd64   :  { %v3840_v6 = vrot.slane %v3832_v39, %v7235_v16  ;;  %v3847_v57 = vrot.slane %v3833_v40, %v7235_v16  ;;  %v4152_v34 = vcombine.low %v4108_v20, %v4140_v38  ;;  %v4153_v7 = vcombine.high %v4108_v20, %v4140_v38 }
 0xd65   :  { %v4084_v19 = vcombine.low %v4028_v8, %v4044_v27  ;;  %v4085_v43 = vcombine.high %v4028_v8, %v4044_v27  ;;  %v4116_v46 = vcombine.low %v4060_v14, %v4076_v5  ;;  %v4117_v58 = vcombine.high %v4060_v14, %v4076_v5 }
 0xd66   :  { %v3880_v59 = vcombine.low %v3824_v1, %v3840_v6  ;;  %v3881_v60 = vcombine.high %v3824_v1, %v3840_v6  ;;  %v3896_v61 = vcombine.low %v3831_v41, %v3847_v57  ;;  %v3897_v62 = vcombine.high %v3831_v41, %v3847_v57  ;;  %6801 = vmatpush3.xpose.msk.msra.mxu1 %vm1454_vm2, %v4152_v34 }
 0xd67   :  { %6811 = vmatpush3.xpose.msk.msra.mxu0 %vm1454_vm2, %v4153_v7  ;;  %v8095_v63 = vpop.permute.xlu1 %3602  ;;  %6805 = vmatprep.subr.mxu1 %v7163_v13  ;;  %v4092_v4 = vrot.slane %v4084_v19, %v7419_v42  ;;  %v4124_v17 = vrot.slane %v4116_v46, %v7419_v42  ;;  %v4115_v18 = vrot.slane %v4101_v21, %v7419_v42 }
 0xd68   :  { %v3888_v29 = vrot.slane %v3880_v59, %v7419_v42  ;;  %v3895_v1 = vrot.slane %v3881_v60, %v7419_v42  ;;  %v3904_v41 = vrot.slane %v3896_v61, %v7419_v42  ;;  %v3911_v28 = vrot.slane %v3897_v62, %v7419_v42  ;;  %6820 = vmatprep.subr.mxu0 %v7163_v13 }
 0xd69   :  { %v3952_v36 = vcombine.low %v8079_v54, %v8095_v63  ;;  %v3953_v23 = vcombine.high %v8079_v54, %v8095_v63  ;;  %v4148_v9 = vcombine.low %v4092_v4, %v4124_v17  ;;  %v4149_v50 = vcombine.high %v4092_v4, %v4124_v17 }
 0xd6a   :  { %v6475_v15 = vcombine.low %v3888_v29, %v3895_v1  ;;  %v6477_v21 = vcombine.high %v3888_v29, %v3895_v1  ;;  %v6479_v25 = vcombine.low %v3904_v41, %v3911_v28  ;;  %v6481_v52 = vcombine.high %v3904_v41, %v3911_v28 }
 0xd6b   :  { %6803 = vmatmul.mubr.msk.f32.vlgmr.msra.gmra.mrb[38].mxu1 %vm1454_vm2, %v4148_v9  ;;  %6813 = vmatmul.mubr.msk.f32.vlgmr.msra.gmra.mrb[8].mxu0 %vm1454_vm2, %v4149_v50  ;;  %v4147_v35 = vrot.slane %v4133_v45, %v7419_v42  ;;  %v3589_v39 = vpop.permute.xlu1 %3588  ;;  %v4099_v45 = vrot.slane %v4085_v43, %v7419_v42  ;;  %v4131_v14 = vrot.slane %v4117_v58, %v7419_v42 }
 0xd6c   :  { %v4164_v40 = vrot.slane %v6475_v15, %v7235_v16  ;;  %v4180_v20 = vrot.slane %v6477_v21, %v7235_v16  ;;  %v4196_v38 = vrot.slane %v6479_v25, %v7235_v16  ;;  %v4212_v8 = vrot.slane %v6481_v52, %v7235_v16  ;;  %6806 = vmatpush3.xpose.msk.msra.mxu1 %vm1454_vm2, %v4288_v26 }
 0xd6d   :  { %v4154_v27 = vcombine.low %v4115_v18, %v4147_v35  ;;  %6807 = vmatprep.mubr.msk.f32.mxu1 %vm7162_vm0, %v7163_v13  ;;  %6815 = vmatprep.subr.mxu1 %v7163_v13  ;;  %v4237_v5 = vcombine.high %v8030_v48, %v8033_v49  ;;  %v4269_v26 = vcombine.high %v8036_v51, %v8039_v2  ;;  %v3595_v2 = vpop.permute.xlu0 %3594 }
 0xd6e   :  { %v4220_v6 = vcombine.low %v4164_v40, %v4180_v20  ;;  %v4252_v57 = vcombine.low %v4196_v38, %v4212_v8  ;;  %6822 = vmatprep.mubr.msk.f32.mxu0 %vm7162_vm0, %v7163_v13  ;;  %v4221_v7 = vcombine.high %v4164_v40, %v4180_v20  ;;  %v4150_v46 = vcombine.low %v4099_v45, %v4131_v14 }
 0xd6f   :  { %6821 = vmatpush3.xpose.msk.msra.mxu0 %vm1454_vm2, %v4154_v27  ;;  %v3601_v34 = vpop.permute.xlu1 %3600  ;;  %v4253_v48 = vcombine.high %v4196_v38, %v4212_v8  ;;  %v4155_v49 = vcombine.high %v4115_v18, %v4147_v35  ;;  %v4251_v51 = vrot.slane %v4237_v5, %v7419_v42  ;;  %v4289_v61 = vcombine.high %v8046_v55, %v8049_v12 }
 0xd70   :  { %6830 = vmatprep.subr.mxu0 %v7163_v13  ;;  %v4228_v19 = vrot.slane %v4220_v6, %v7419_v42  ;;  %v4260_v43 = vrot.slane %v4252_v57, %v7419_v42  ;;  %v3748_v58 = vcombine.low %v3589_v39, %v3601_v34  ;;  %v3749_v59 = vcombine.high %v3589_v39, %v3601_v34 }
 0xd71   :  { %v4283_v62 = vrot.slane %v4269_v26, %v7419_v42  ;;  %v4151_v4 = vcombine.high %v4099_v45, %v4131_v14  ;;  %v4235_v1 = vrot.slane %v4221_v7, %v7419_v42  ;;  %v4267_v41 = vrot.slane %v4253_v48, %v7419_v42 }
 0xd72   :  { %v4284_v60 = vcombine.low %v4228_v19, %v4260_v43  ;;  %6823 = vmatmul.mubr.msk.f32.vlgmr.msra.gmra.mrb[10].mxu0 %vm1454_vm2, %v4150_v46  ;;  %v3756_v55 = vrot.slane %v3748_v58, %v7235_v16  ;;  %v3763_v12 = vrot.slane %v3749_v59, %v7235_v16  ;;  %v4285_v28 = vcombine.high %v4228_v19, %v4260_v43 }
 0xd73   :  { %6831 = vmatpush3.xpose.msk.msra.mxu0 %vm1454_vm2, %v4155_v49  ;;  %6832 = vmatprep.mubr.msk.f32.mxu0 %vm7162_vm0, %v7163_v13  ;;  %v3607_v17 = vpop.permute.xlu1 %3606  ;;  %v4290_v15 = vcombine.low %v4251_v51, %v4283_v62  ;;  %v4286_v39 = vcombine.low %v4235_v1, %v4267_v41  ;;  %v4291_v27 = vcombine.high %v4251_v51, %v4283_v62 }
 0xd74   :  { %6808 = vmatmul.mubr.msk.f32.vlgmr.msra.gmra.mrb[40].mxu1 %vm1454_vm2, %v4284_v60  ;;  %v3764_v18 = vcombine.low %v3595_v2, %v3607_v17  ;;  %v3765_v29 = vcombine.high %v3595_v2, %v3607_v17  ;;  %6840 = vmatprep.subr.mxu0 %v7163_v13  ;;  %v4287_v57 = vcombine.high %v4235_v1, %v4267_v41 }
 0xd75   :  { %6816 = vmatpush3.xpose.msk.msra.mxu1 %vm1454_vm2, %v4289_v61  ;;  %6817 = vmatprep.mubr.msk.f32.mxu1 %vm7162_vm0, %v7163_v13 }
 0xd76   :  { %6825 = vmatprep.subr.mxu1 %v7163_v13  ;;  %6833 = vmatmul.mubr.msk.f32.vlgmr.msra.gmra.mrb[12].mxu0 %vm1454_vm2, %v4151_v4  ;;  %v3772_v9 = vrot.slane %v3764_v18, %v7235_v16  ;;  %v3779_v50 = vrot.slane %v3765_v29, %v7235_v16 }
 0xd77   :  { %6842 = vmatprep.mubr.msk.f32.mxu0 %vm7162_vm0, %v7163_v13 }
 0xd78   :  { %6818 = vmatmul.mubr.msk.f32.vlgmr.msra.gmra.mrb[42].mxu1 %vm1454_vm2, %v4285_v28  ;;  %v3780_v21 = vcombine.low %v3756_v55, %v3772_v9  ;;  %v3781_v25 = vcombine.high %v3756_v55, %v3772_v9  ;;  %v3796_v52 = vcombine.low %v3763_v12, %v3779_v50  ;;  %v3797_v35 = vcombine.high %v3763_v12, %v3779_v50 }
 0xd79   :  { %6826 = vmatpush3.xpose.msk.msra.mxu1 %vm1454_vm2, %v4290_v15  ;;  %6827 = vmatprep.mubr.msk.f32.mxu1 %vm7162_vm0, %v7163_v13 }
 0xd7a   :  { %v3788_v40 = vrot.slane %v3780_v21, %v7419_v42  ;;  %v3795_v20 = vrot.slane %v3781_v25, %v7419_v42  ;;  %v3804_v38 = vrot.slane %v3796_v52, %v7419_v42  ;;  %v3811_v8 = vrot.slane %v3797_v35, %v7419_v42  ;;  %6835 = vmatprep.subr.mxu1 %v7163_v13 }
 0xd7c   :  { %v4292_v45 = vcombine.low %v3788_v40, %v3795_v20  ;;  %v6483_v14 = vcombine.high %v3788_v40, %v3795_v20  ;;  %v4308_v5 = vcombine.low %v3804_v38, %v3811_v8  ;;  %v6484_v6 = vcombine.high %v3804_v38, %v3811_v8  ;;  %6828 = vmatmul.mubr.msk.f32.vlgmr.msra.gmra.mrb[44].mxu1 %vm1454_vm2, %v4286_v39 }
 0xd7d   :  { %6836 = vmatpush3.xpose.msk.msra.mxu1 %vm1454_vm2, %v4291_v27  ;;  %6837 = vmatprep.mubr.msk.f32.mxu1 %vm7162_vm0, %v7163_v13 }
 0xd7e   :  { %v4299_v26 = vrot.slane %v4292_v45, %v7235_v16  ;;  %v4307_v34 = vrot.slane %v6483_v14, %v7235_v16  ;;  %v4315_v7 = vrot.slane %v4308_v5, %v7235_v16  ;;  %v4323_v19 = vrot.slane %v6484_v6, %v7235_v16  ;;  %6845 = vmatprep.subr.mxu1 %v7163_v13 }
 0xd80   :  { %6838 = vmatmul.mubr.msk.f32.vlgmr.msra.gmra.mrb[46].mxu1 %vm1454_vm2, %v4287_v57  ;;  %v4324_v43 = vcombine.low %v4299_v26, %v4307_v34  ;;  %v4340_v46 = vcombine.low %v4315_v7, %v4323_v19  ;;  %v4325_v48 = vcombine.high %v4299_v26, %v4307_v34  ;;  %v4341_v49 = vcombine.high %v4315_v7, %v4323_v19 }
 0xd81   :  { %6847 = vmatprep.mubr.msk.f32.mxu1 %vm7162_vm0, %v7163_v13 }
 0xd82   :  { %v8181_v58 = vrot.slane %v4324_v43, %v7419_v42  ;;  %v8184_v59 = vrot.slane %v4340_v46, %v7419_v42  ;;  %v8187_v60 = vrot.slane %v4325_v48, %v7419_v42  ;;  %v8190_v51 = vrot.slane %v4341_v49, %v7419_v42 }
 0xd84   :  { %v4356_v2 = vcombine.low %v8181_v58, %v8184_v59  ;;  %v4357_v61 = vcombine.high %v8181_v58, %v8184_v59  ;;  %v4358_v62 = vcombine.low %v8187_v60, %v8190_v51  ;;  %v4359_v4 = vcombine.high %v8187_v60, %v8190_v51 }
 0xd86   :  { %6841 = vmatpush3.msra.mxu0 %v4356_v2 }
 0xd87   :  { %6850 = vmatprep.subr.mxu0 %v7163_v13 }
 0xe3e   :  { %v4500_v17 = vpop.f32.mrb[38].mxu1  ;;  %v4652_v18 = vpop.f32.mrb[8].mxu0 }
 0xe3f   :  { %v5036_v29 = vmul.f32 0.35355338, %v4500_v17  ;;  %v5038_v1 = vmul.f32 0.35355338, %v4652_v18  ;;  %v6804_v55 = vpop.f32.mrb[39].mxu1  ;;  %v6814_v12 = vpop.f32.mrb[9].mxu0 }
 0xe41   :  { %v5044_v41 = vmul.f32 1.442695, %v5036_v29  ;;  %v5048_v28 = vmul.f32 1.442695, %v5038_v1 }
 0xe43   :  { %7112 = vpow2.f32 %v5044_v41 }
 0xe44   :  { %7114 = vpow2.f32 %v5048_v28 }
 0xe45   :  { %v4804_v9 = vpop.f32.mrb[10].mxu0 }
 0xe46   :  { %v5040_v50 = vmul.f32 0.35355338, %v4804_v9  ;;  %v6824_v15 = vpop.f32.mrb[11].mxu0 }
 0xe47   :  { %v4576_v21 = vpop.f32.mrb[40].mxu1 }
 0xe48   :  { %v5037_v25 = vmul.f32 0.35355338, %v4576_v21  ;;  %v5052_v52 = vmul.f32 1.442695, %v5040_v50  ;;  %v6809_v35 = vpop.f32.mrb[41].mxu1 }
 0xe49   :  { %v4956_v39 = vpop.f32.mrb[12].mxu0 }
 0xe4a   :  { %v5046_v40 = vmul.f32 1.442695, %v5037_v25  ;;  %7116 = vpow2.f32 %v5052_v52  ;;  %v5042_v20 = vmul.f32 0.35355338, %v4956_v39  ;;  %v6834_v38 = vpop.f32.mrb[13].mxu0 }
 0xe4b   :  { %v4728_v8 = vpop.f32.mrb[42].mxu1 }
 0xe4c   :  { %7118 = vpow2.f32 %v5046_v40  ;;  %v5039_v27 = vmul.f32 0.35355338, %v4728_v8  ;;  %v6819_v45 = vpop.f32.mrb[43].mxu1  ;;  %v5056_v6 = vmul.f32 1.442695, %v5042_v20 }
 0xe4d   :  { %v7113_v14 = vpop.eup %7112 }
 0xe4e   :  { %v5050_v5 = vmul.f32 1.442695, %v5039_v27  ;;  %v5060_v57 = vsel %vm1454_vm2, %v7113_v14, 0.0  ;;  %v7115_v26 = vpop.eup %7114 }
 0xe4f   :  { %v4880_v34 = vpop.f32.mrb[44].mxu1  ;;  %5061 = vadd.xlane.f32.xlu0 %v5060_v57  ;;  %v5066_v19 = vsel %vm1454_vm2, %v7115_v26, 0.0 }
 0xe50   :  { %7120 = vpow2.f32 %v5050_v5  ;;  %v6829_v7 = vpop.f32.mrb[45].mxu1  ;;  %v5041_v50 = vmul.f32 0.35355338, %v4880_v34 }
 0xe51   :  { %7122 = vpow2.f32 %v5056_v6  ;;  %v3960_v6 = vrot.slane %v3952_v36, %v7235_v16 }
 0xe52   :  { %v5054_v15 = vmul.f32 1.442695, %v5041_v50 }
 0xe53   :  { %v5032_v43 = vpop.f32.mrb[46].mxu1  ;;  %5067 = vadd.xlane.f32.xlu0 %v5066_v19 }
 0xe54   :  { %v7117_v46 = vpop.eup %7116  ;;  %v5043_v48 = vmul.f32 0.35355338, %v5032_v43  ;;  %v6839_v49 = vpop.f32.mrb[47].mxu1 }
 0xe55   :  { %v5072_v18 = vsel %vm1454_vm2, %v7117_v46, 0.0 }
 0xe56   :  { %v8203_v2 = vpop.eup %7118  ;;  %v5058_v17 = vmul.f32 1.442695, %v5043_v48 }
 0xe57   :  { %v5063_v29 = vsel %vm1454_vm2, %v8203_v2, 0.0  ;;  %5073 = vadd.xlane.f32.xlu0 %v5072_v18 }
 0xe58   :  { %7124 = vpow2.f32 %v5058_v17  ;;  %5064 = vadd.xlane.f32.xlu1 %v5063_v29 }
 0xe59   :  { %7126 = vpow2.f32 %v5054_v15 }
 0xe5a   :  { %v8208_v1 = vpop.eup %7120 }
 0xe5b   :  { %v5069_v55 = vsel %vm1454_vm2, %v8208_v1, 0.0  ;;  %v8212_v12 = vpop.eup %7122 }
 0xe5c   :  { %5070 = vadd.xlane.f32.xlu0 %v5069_v55  ;;  %v5078_v41 = vsel %vm1454_vm2, %v8212_v12, 0.0 }
 0xe60   :  { %5079 = vadd.xlane.f32.xlu0 %v5078_v41 }
 0xe62   :  { %v8216_v28 = vpop.eup %7124 }
 0xe63   :  { %v5081_v9 = vsel %vm1454_vm2, %v8216_v28, 0.0  ;;  %v8222_v21 = vpop.eup %7126 }
 0xe64   :  { %5082 = vadd.xlane.f32.xlu0 %v5081_v9  ;;  %v5075_v25 = vsel %vm1454_vm2, %v8222_v21, 0.0 }
 0xe69   :  { %3608 = vrot.lane.b32.xlu1 %v7973_v33, %s7174_s15 }
 0xe8d   :  { %5076 = vadd.xlane.f32.xlu1 %v5075_v25 }
 0xedc   :  { %v5062_v52 = vpop.xlane.xlu0 %5061 }
 0xedd   :  { %7128 = vrcp.f32 %v5062_v52 }
 0xee0   :  { %v5068_v35 = vpop.xlane.xlu0 %5067 }
 0xee1   :  { %7130 = vrcp.f32 %v5068_v35 }
 0xee4   :  { %v5074_v39 = vpop.xlane.xlu0 %5073 }
 0xee5   :  { %v5065_v40 = vpop.xlane.xlu1 %5064  ;;  %7132 = vrcp.f32 %v5074_v39 }
 0xee6   :  { %7134 = vrcp.f32 %v5065_v40 }
 0xee7   :  { %v7129_v20 = vpop.eup %7128 }
 0xee8   :  { %v5092_v38 = vmul.f32 %v7129_v20, %v7113_v14 }
 0xee9   :  { %v3609_v8 = vpop.permute.xlu1 %3608  ;;  %v5071_v33 = vpop.xlane.xlu0 %5070 }
 0xeea   :  { %v3968_v27 = vcombine.low %v8089_v0, %v3609_v8  ;;  %v3969_v45 = vcombine.high %v8089_v0, %v3609_v8  ;;  %6843 = vmatmul.mubr.msk.f32.vlgmr.msra.gmra.mrb[14].mxu0 %vm1454_vm2, %v5092_v38  ;;  %v3967_v0 = vrot.slane %v3953_v23, %v7235_v16 }
 0xeeb   :  { %v7131_v5 = vpop.eup %7130  ;;  %6851 = vmatpush3.msra.mxu0 %v4357_v61  ;;  %6852 = vmatprep.mubr.msk.f32.mxu0 %vm7162_vm0, %v7163_v13 }
 0xeec   :  { %v5094_v14 = vmul.f32 %v7131_v5, %v7115_v26  ;;  %v3976_v57 = vrot.slane %v3968_v27, %v7235_v16  ;;  %v3983_v34 = vrot.slane %v3969_v45, %v7235_v16  ;;  %6860 = vmatprep.subr.mxu0 %v7163_v13 }
 0xeed   :  { %v5080_v36 = vpop.xlane.xlu0 %5079 }
 0xeee   :  { %v3984_v7 = vcombine.low %v3960_v6, %v3976_v57  ;;  %v3985_v58 = vcombine.high %v3960_v6, %v3976_v57  ;;  %v4000_v59 = vcombine.low %v3967_v0, %v3983_v34  ;;  %v4001_v61 = vcombine.high %v3967_v0, %v3983_v34  ;;  %6853 = vmatmul.mubr.msk.f32.vlgmr.msra.gmra.mrb[16].mxu0 %vm1454_vm2, %v5094_v14 }
 0xeef   :  { %v7133_v19 = vpop.eup %7132  ;;  %7136 = vrcp.f32 %v5080_v36  ;;  %6861 = vmatpush3.msra.mxu0 %v4358_v62  ;;  %6862 = vmatprep.mubr.msk.f32.mxu0 %vm7162_vm0, %v7163_v13 }
 0xef0   :  { %v5096_v54 = vmul.f32 %v7133_v19, %v7117_v46  ;;  %v3992_v63 = vrot.slane %v3984_v7, %v7419_v42  ;;  %v3999_v23 = vrot.slane %v3985_v58, %v7419_v42  ;;  %v4008_v26 = vrot.slane %v4000_v59, %v7419_v42  ;;  %6870 = vmatprep.subr.mxu0 %v7163_v13  ;;  %v7135_v50 = vpop.eup %7134 }
 0xef1   :  { %v4015_v43 = vrot.slane %v4001_v61, %v7419_v42  ;;  %7138 = vrcp.f32 %v5071_v33  ;;  %v5093_v33 = vmul.f32 %v7135_v50, %v8203_v2  ;;  %v5083_v2 = vpop.xlane.xlu0 %5082 }
 0xef2   :  { %v4360_v48 = vcombine.low %v3992_v63, %v3999_v23  ;;  %v6485_v49 = vcombine.high %v3992_v63, %v3999_v23  ;;  %6863 = vmatmul.mubr.msk.f32.vlgmr.msra.gmra.mrb[18].mxu0 %vm1454_vm2, %v5096_v54 }
 0xef3   :  { %v4376_v17 = vcombine.low %v4008_v26, %v4015_v43  ;;  %v6486_v62 = vcombine.high %v4008_v26, %v4015_v43  ;;  %6871 = vmatpush3.msra.mxu0 %v4359_v4  ;;  %6872 = vmatprep.mubr.msk.f32.mxu0 %vm7162_vm0, %v7163_v13 }
 0xef4   :  { %v4367_v46 = vrot.slane %v4360_v48, %v7235_v16  ;;  %v4375_v18 = vrot.slane %v6485_v49, %v7235_v16 }
 0xef5   :  { %v4383_v29 = vrot.slane %v4376_v17, %v7235_v16  ;;  %v4391_v55 = vrot.slane %v6486_v62, %v7235_v16 }
 0xef6   :  { %v4392_v41 = vcombine.low %v4367_v46, %v4375_v18  ;;  %v4393_v9 = vcombine.high %v4367_v46, %v4375_v18 }
 0xef7   :  { %v4408_v15 = vcombine.low %v4383_v29, %v4391_v55  ;;  %v4409_v25 = vcombine.high %v4383_v29, %v4391_v55 }
 0xef8   :  { %v4400_v52 = vrot.slane %v4392_v41, %v7419_v42  ;;  %v4407_v60 = vrot.slane %v4393_v9, %v7419_v42 }
 0xef9   :  { %v7137_v51 = vpop.eup %7136  ;;  %v4416_v4 = vrot.slane %v4408_v15, %v7419_v42  ;;  %v4423_v35 = vrot.slane %v4409_v25, %v7419_v42 }
 0xefa   :  { %v5098_v39 = vmul.f32 %v7137_v51, %v8212_v12  ;;  %v3434_v51 = vld [vmem:[%s8457_s3 + $0x60] sm:$0xff] }
 0xefb   :  { %v4424_v40 = vcombine.low %v4400_v52, %v4416_v4  ;;  %v4425_v20 = vcombine.high %v4400_v52, %v4416_v4  ;;  %v4426_v38 = vcombine.low %v4407_v60, %v4423_v35  ;;  %v4427_v8 = vcombine.high %v4407_v60, %v4423_v35  ;;  %v7139_v27 = vpop.eup %7138  ;;  %v3435_v4 = vld [vmem:[%s8457_s3 + $0x68] sm:$0xff] }
 0xefc   :  { %6873 = vmatmul.mubr.msk.f32.vlgmr.msra.gmra.mrb[20].mxu0 %vm1454_vm2, %v5098_v39  ;;  %v5095_v12 = vmul.f32 %v7139_v27, %v8208_v1 }
 0xefd   :  { %6846 = vmatpush3.msra.mxu1 %v4424_v40 }
 0xefe   :  { %6848 = vmatmul.mubr.msk.f32.vlgmr.msra.gmra.mrb[48].mxu1 %vm1454_vm2, %v5093_v33  ;;  %6855 = vmatprep.subr.mxu1 %v7163_v13 }
 0xeff   :  { %6856 = vmatpush3.msra.mxu1 %v4425_v20  ;;  %6857 = vmatprep.mubr.msk.f32.mxu1 %vm7162_vm0, %v7163_v13 }
 0xf00   :  { %6865 = vmatprep.subr.mxu1 %v7163_v13 }
 0xf02   :  { %6858 = vmatmul.mubr.msk.f32.vlgmr.msra.gmra.mrb[50].mxu1 %vm1454_vm2, %v5095_v12 }
 0xf03   :  { %6866 = vmatpush3.msra.mxu1 %v4426_v38  ;;  %6867 = vmatprep.mubr.msk.f32.mxu1 %vm7162_vm0, %v7163_v13  ;;  %v7007_v38 = vpack.c.bf16 %v3435_v4, %v3434_v51 }
 0xf04   :  { %6875 = vmatprep.subr.mxu1 %v7163_v13 }
 0xf05   :  { %7008 = vmatprep.subr.bf16.mxu0 %v7007_v38 }
 0xf06   :  { %7010 = vmatpush3.bf16.msra.mxu0 %v7007_v38 }
 0xf1a   :  { %v5077_v45 = vpop.xlane.xlu1 %5076 }
 0xf1b   :  { %7140 = vrcp.f32 %v5077_v45 }
 0xf1c   :  { %7142 = vrcp.f32 %v5083_v2 }
 0xf25   :  { %v7141_v5 = vpop.eup %7140 }
 0xf26   :  { %v5097_v6 = vmul.f32 %v7141_v5, %v8222_v21  ;;  %v7143_v0 = vpop.eup %7142 }
 0xf27   :  { %v5099_v1 = vmul.f32 %v7143_v0, %v8216_v28 }
 0xf28   :  { %6868 = vmatmul.mubr.msk.f32.vlgmr.msra.gmra.mrb[52].mxu1 %vm1454_vm2, %v5097_v6 }
 0xf29   :  { %6876 = vmatpush3.msra.mxu1 %v4427_v8  ;;  %6877 = vmatprep.mubr.msk.f32.mxu1 %vm7162_vm0, %v7163_v13 }
 0xf2c   :  { %6878 = vmatmul.mubr.msk.f32.vlgmr.msra.gmra.mrb[54].mxu1 %vm1454_vm2, %v5099_v1 }
 0xfbd   :  { %v5169_v14 = vpop.f32.mrb[14].mxu0 }
 0xfbe   :  { %v6844_v57 = vpop.f32.mrb[15].mxu0 }
 0xfc1   :  { %v5315_v34 = vpop.f32.mrb[16].mxu0 }
 0xfc2   :  { %v6854_v36 = vpop.f32.mrb[17].mxu0 }
 0xfc5   :  { %v5461_v7 = vpop.f32.mrb[18].mxu0 }
 0xfc6   :  { %v5684_v58 = vcombine.low %v5169_v14, %v5461_v7  ;;  %v5685_v59 = vcombine.high %v5169_v14, %v5461_v7  ;;  %v6864_v61 = vpop.f32.mrb[19].mxu0 }
 0xfc8   :  { %v5692_v26 = vrot.slane %v5684_v58, %v7235_v16  ;;  %v5699_v13 = vrot.slane %v5685_v59, %v7235_v16 }
 0xfcf   :  { %v5607_v21 = vpop.f32.mrb[20].mxu0 }
 0xfd0   :  { %v5700_v19 = vcombine.low %v5315_v34, %v5607_v21  ;;  %v5701_v54 = vcombine.high %v5315_v34, %v5607_v21  ;;  %v6874_v63 = vpop.f32.mrb[21].mxu0 }
 0xfd1   :  { %v5242_v23 = vpop.f32.mrb[48].mxu1 }
 0xfd2   :  { %v6849_v28 = vpop.f32.mrb[49].mxu1  ;;  %v5708_v43 = vrot.slane %v5700_v19, %v7235_v16  ;;  %v5715_v48 = vrot.slane %v5701_v54, %v7235_v16 }
 0xfd4   :  { %v5716_v49 = vcombine.low %v5692_v26, %v5708_v43  ;;  %v5717_v17 = vcombine.high %v5692_v26, %v5708_v43  ;;  %v5732_v62 = vcombine.low %v5699_v13, %v5715_v48  ;;  %v5733_v46 = vcombine.high %v5699_v13, %v5715_v48 }
 0xfd5   :  { %v5388_v18 = vpop.f32.mrb[50].mxu1 }
 0xfd6   :  { %v5724_v29 = vrot.slane %v5716_v49, %v7419_v42  ;;  %v5731_v55 = vrot.slane %v5717_v17, %v7419_v42  ;;  %v5740_v41 = vrot.slane %v5732_v62, %v7419_v42  ;;  %v5747_v9 = vrot.slane %v5733_v46, %v7419_v42  ;;  %v6859_v50 = vpop.f32.mrb[51].mxu1  ;;  %v3437_v17 = vld [vmem:[%s8457_s3 + $0x78] sm:$0xff] }
 0xfd8   :  { %v5820_v15 = vcombine.low %v5724_v29, %v5731_v55  ;;  %v6511_v25 = vcombine.high %v5724_v29, %v5731_v55  ;;  %v5836_v52 = vcombine.low %v5740_v41, %v5747_v9  ;;  %v6512_v60 = vcombine.high %v5740_v41, %v5747_v9 }
 0xfda   :  { %v5827_v35 = vrot.slane %v5820_v15, %v7235_v16  ;;  %v5835_v39 = vrot.slane %v6511_v25, %v7235_v16  ;;  %v5843_v40 = vrot.slane %v5836_v52, %v7235_v16  ;;  %v5851_v20 = vrot.slane %v6512_v60, %v7235_v16 }
 0xfdc   :  { %v5852_v8 = vcombine.low %v5827_v35, %v5835_v39  ;;  %v5868_v33 = vcombine.low %v5843_v40, %v5851_v20  ;;  %v5853_v27 = vcombine.high %v5827_v35, %v5835_v39  ;;  %v5869_v12 = vcombine.high %v5843_v40, %v5851_v20 }
 0xfde   :  { %v8308_v2 = vrot.slane %v5852_v8, %v7419_v42  ;;  %v8311_v45 = vrot.slane %v5868_v33, %v7419_v42  ;;  %v5867_v5 = vrot.slane %v5853_v27, %v7419_v42  ;;  %v5883_v6 = vrot.slane %v5869_v12, %v7419_v42 }
 0xfe0   :  { %v5885_v0 = vcombine.high %v8308_v2, %v8311_v45  ;;  %v5886_v1 = vcombine.low %v5867_v5, %v5883_v6  ;;  %v5887_v14 = vcombine.high %v5867_v5, %v5883_v6  ;;  %v5884_v57 = vcombine.low %v8308_v2, %v8311_v45 }
 0xfe2   :  { %5958 = vrot.lane.b32.xlu0 %v5885_v0, %s7176_s16 }
 0xfe6   :  { %5966 = vrot.lane.b32.xlu0 %v5886_v1, %s7177_s17 }
 0xffb   :  { %v5534_v34 = vpop.f32.mrb[52].mxu1 }
 0xffc   :  { %v5752_v36 = vcombine.low %v5242_v23, %v5534_v34  ;;  %v5753_v7 = vcombine.high %v5242_v23, %v5534_v34  ;;  %v6869_v58 = vpop.f32.mrb[53].mxu1  ;;  %v3436_v23 = vld [vmem:[%s8457_s3 + $0x70] sm:$0xff] }
 0xffd   :  { %v7011_v55 = vpack.c.bf16 %v3437_v17, %v3436_v23 }
 0xffe   :  { %v5760_v54 = vrot.slane %v5752_v36, %v7235_v16  ;;  %v5767_v63 = vrot.slane %v5753_v7, %v7235_v16 }
 0xfff   :  { %v5680_v59 = vpop.f32.mrb[54].mxu1  ;;  %7012 = vmatprep.subr.bf16.mxu0 %v7011_v55 }
0x1000   :  { %v5768_v61 = vcombine.low %v5388_v18, %v5680_v59  ;;  %v5769_v21 = vcombine.high %v5388_v18, %v5680_v59  ;;  %v6879_v19 = vpop.f32.mrb[55].mxu1  ;;  %7014 = vmatpush3.bf16.msra.mxu0 %v7011_v55 }
0x1002   :  { %v5776_v26 = vrot.slane %v5768_v61, %v7235_v16  ;;  %v5783_v13 = vrot.slane %v5769_v21, %v7235_v16  ;;  %v8358_v61 = vld [vmem:[%s8459_s4 + $0x10] sm:$0xff] }
0x1004   :  { %v5784_v28 = vcombine.low %v5760_v54, %v5776_v26  ;;  %v5785_v43 = vcombine.high %v5760_v54, %v5776_v26  ;;  %v5800_v48 = vcombine.low %v5767_v63, %v5783_v13  ;;  %v5801_v49 = vcombine.high %v5767_v63, %v5783_v13 }
0x1006   :  { %v5792_v62 = vrot.slane %v5784_v28, %v7419_v42  ;;  %v5799_v46 = vrot.slane %v5785_v43, %v7419_v42  ;;  %v5808_v18 = vrot.slane %v5800_v48, %v7419_v42  ;;  %v5815_v29 = vrot.slane %v5801_v49, %v7419_v42 }
0x1007   :  { %v3453_v48 = vrot.slane %v8358_v61, %v7851_v30 }
0x1008   :  { %v5888_v41 = vcombine.low %v5792_v62, %v5799_v46  ;;  %v6513_v9 = vcombine.high %v5792_v62, %v5799_v46  ;;  %v5904_v50 = vcombine.low %v5808_v18, %v5815_v29  ;;  %v6514_v15 = vcombine.high %v5808_v18, %v5815_v29 }
0x100a   :  { %v5895_v25 = vrot.slane %v5888_v41, %v7235_v16  ;;  %v5903_v52 = vrot.slane %v6513_v9, %v7235_v16  ;;  %v5911_v60 = vrot.slane %v5904_v50, %v7235_v16  ;;  %v5919_v51 = vrot.slane %v6514_v15, %v7235_v16 }
0x100c   :  { %v5921_v4 = vcombine.high %v5895_v25, %v5903_v52  ;;  %v5937_v35 = vcombine.high %v5911_v60, %v5919_v51  ;;  %v5920_v39 = vcombine.low %v5895_v25, %v5903_v52  ;;  %v5936_v40 = vcombine.low %v5911_v60, %v5919_v51 }
0x100e   :  { %v5935_v20 = vrot.slane %v5921_v4, %v7419_v42  ;;  %v5951_v38 = vrot.slane %v5937_v35, %v7419_v42  ;;  %v5928_v8 = vrot.slane %v5920_v39, %v7419_v42  ;;  %v5944_v33 = vrot.slane %v5936_v40, %v7419_v42 }
0x1010   :  { %v5954_v27 = vcombine.low %v5935_v20, %v5951_v38  ;;  %v5953_v12 = vcombine.high %v5928_v8, %v5944_v33  ;;  %v5955_v2 = vcombine.high %v5935_v20, %v5951_v38  ;;  %v5952_v45 = vcombine.low %v5928_v8, %v5944_v33 }
0x1011   :  { %v6102_v38 = vrot.slane %v8358_v61, %v3131_v44 }
0x1012   :  { %5968 = vrot.lane.b32.xlu0 %v5954_v27, %s7177_s17  ;;  %5960 = vrot.lane.b32.xlu1 %v5953_v12, %s7176_s16  ;;  %s7180_s16 = smov 32  }
0x1016   :  { %5974 = vrot.lane.b32.xlu0 %v5887_v14, %s7178_s18  ;;  %5976 = vrot.lane.b32.xlu1 %v5955_v2, %s7178_s18 }
0x1054   :  { %v5959_v16 = vpop.permute.xlu0 %5958 }
0x1055   :  { %v5980_v42 = vsel %vm1454_vm2, %v5884_v57, %v5959_v16  ;;  %v5989_v57 = vrot.slane %v8358_v61, %v7831_v47 }
0x1058   :  { %v5967_v5 = vpop.permute.xlu0 %5966 }
0x1059   :  { %v5982_v34 = vsel %vm3009_vm3, %v5980_v42, %v5967_v5 }
0x1084   :  { %v5969_v6 = vpop.permute.xlu0 %5968  ;;  %v5961_v0 = vpop.permute.xlu1 %5960 }
0x1085   :  { %v5981_v1 = vsel %vm1454_vm2, %v5952_v45, %v5961_v0 }
0x1086   :  { %v5983_v58 = vsel %vm3009_vm3, %v5981_v1, %v5969_v6 }
0x1088   :  { %v5975_v36 = vpop.permute.xlu0 %5974  ;;  %v5977_v7 = vpop.permute.xlu1 %5976 }
0x1089   :  { %v5984_v59 = vsel %vm3012_vm4, %v5982_v34, %v5975_v36  ;;  %v5985_v14 = vsel %vm3012_vm4, %v5983_v58, %v5977_v7 }
0x108a   :  { %6888 = vmatprep.mubr.msk.f32.mxu0 %vm382_vm1, %v5984_v59 }
0x108b   :  { %6889 = vmatmul.mubr.msk.f32.vlgmr.msra.gmra.mrb[22].mxu0 %vm382_vm1, %v5985_v14 }
0x115e   :  { %v6890_v21 = vpop.f32.mrb[22].mxu0 }
0x115f   :  { %v6068_v19 = vadd.f32 %v6890_v21, %v5989_v57  ;;  %v6062_v54 = vpop.f32.mrb[23].mxu0 }
0x1160   :  { %v6063_v63 = vadd.f32 %v6062_v54, %v5989_v57 }
0x1161   :  { %v6072_v26 = vadd.f32 %v6068_v19, %v7961_v32 }
0x1162   :  { %v6071_v13 = vadd.f32 %v6063_v63, %v7959_v31  ;;  %v3438_v63 = vld [vmem:[%s8457_s3 + $0xc0] sm:$0xff] }
0x1163   :  { %v6076_v28 = vsel %vm382_vm1, %v6072_v26, 0.0 }
0x1164   :  { %6077 = vadd.xlane.f32.xlu1 %v6076_v28  ;;  %v6073_v43 = vsel %vm382_vm1, %v6071_v13, 0.0 }
0x1165   :  { %6074 = vadd.xlane.f32.xlu0 %v6073_v43  ;;  %v3441_v43 = vld [vmem:[%s8457_s3 + $0xd8] sm:$0xff] }
0x117b   :  { %3455 = vrot.lane.b32.xlu0 %v3453_v48, %s7180_s16 }
0x11f1   :  { %v6078_v49 = vpop.xlane.xlu1 %6077 }
0x11f2   :  { %v6080_v23 = vmul.f32 0.03125, %v6078_v49  ;;  %v6075_v17 = vpop.xlane.xlu0 %6074  ;;  %v3442_v49 = vld [vmem:[%s8457_s3 + $0x120] sm:$0xff] }
0x11f3   :  { %v6079_v62 = vmul.f32 0.03125, %v6075_v17  ;;  %v3444_v17 = vld [vmem:[%s8457_s3 + $0x130] sm:$0xff] }
0x11f4   :  { %v6082_v46 = vsub.f32 %v6072_v26, %v6080_v23  ;;  %v3439_v26 = vld [vmem:[%s8457_s3 + $0xc8] sm:$0xff] }
0x11f5   :  { %v6081_v18 = vsub.f32 %v6071_v13, %v6079_v62  ;;  %v3440_v13 = vld [vmem:[%s8457_s3 + $0xd0] sm:$0xff]  ;;  %v7015_v28 = vpack.c.bf16 %v3439_v26, %v3438_v63  ;;  %v3443_v23 = vld [vmem:[%s8457_s3 + $0x128] sm:$0xff] }
0x11f6   :  { %v3456_v32 = vpop.permute.xlu0 %3455  ;;  %v6084_v29 = vmul.f32 %v6082_v46, %v6082_v46  ;;  %v7019_v48 = vpack.c.bf16 %v3441_v43, %v3440_v13  ;;  %v7023_v62 = vpack.c.bf16 %v3443_v23, %v3442_v49 }
0x11f7   :  { %v3458_v31 = vadd.f32 %v3456_v32, %v7363_v22  ;;  %v6083_v41 = vmul.f32 %v6081_v18, %v6081_v18  ;;  %7016 = vmatprep.subr.bf16.mxu1 %v7015_v28  ;;  %v3446_v32 = vld [vmem:[%s8457_s3 + $0x140] sm:$0xff] }
0x11f8   :  { %v6088_v55 = vsel %vm382_vm1, %v6084_v29, 0.0  ;;  %7018 = vmatpush3.bf16.msra.mxu1 %v7015_v28  ;;  %v3447_v29 = vld [vmem:[%s8457_s3 + $0x148] sm:$0xff]  ;;  %7024 = vmatprep.subr.bf16.mxu0 %v7023_v62 }
0x11f9   :  { %v6118_v9 = vrot.slane %v3458_v31, %v7857_v56  ;;  %6089 = vadd.xlane.f32.xlu1 %v6088_v55  ;;  %v6085_v15 = vsel %vm382_vm1, %v6083_v41, 0.0  ;;  %7020 = vmatprep.subr.bf16.mxu1 %v7019_v48  ;;  %v7031_v31 = vpack.c.bf16 %v3447_v29, %v3446_v32 }
0x11fa   :  { %7026 = vmatpush3.bf16.msra.mxu0 %v7023_v62 }
0x11fb   :  { %v6119_v50 = vcombine.high %v6118_v9, %v6118_v9  ;;  %v6126_v60 = vrot.slane %v6118_v9, %v7857_v56 }
0x11fc   :  { %7022 = vmatpush3.bf16.msra.mxu1 %v7019_v48 }
0x11fd   :  { %6086 = vadd.xlane.f32.xlu1 %v6085_v15  ;;  %v6133_v25 = vrot.slane %v6119_v50, %v7857_v56  ;;  %v6137_v22 = vrot.slane %v6126_v60, %v7366_v24  ;;  %v6108_v56 = vrot.slane %v8358_v61, %v3137_v37  ;;  %v6179_v60 = vrot.slane %v8358_v61, %v3204_v3  ;;  %v3449_v3 = vld [vmem:[%s8457_s3 + $0x158] sm:$0xff] }
0x11ff   :  { %v6141_v52 = vrot.slane %v6133_v25, %v7366_v24 }
0x1201   :  { %6144 = vrot.lane.b32.xlu0 %v6141_v52, %s7165_s6  ;;  %v6464_v52 = vld [vmem:[%s8459_s4 + $0x18] sm:$0xff] }
0x1202   :  { %v6391_v48 = vrot.slane %v6464_v52, %v7831_v47 }
0x120e   :  { %6142 = vrot.lane.b32.xlu1 %v6137_v22, %s7165_s6 }
0x1273   :  { %v6145_v16 = vpop.permute.xlu0 %6144 }
0x1286   :  { %v6090_v51 = vpop.xlane.xlu1 %6089 }
0x1287   :  { %v6092_v4 = vmul.f32 0.03125, %v6090_v51 }
0x1289   :  { %v6094_v35 = vadd.f32 1e-05, %v6092_v4  ;;  %v6185_v4 = vrot.slane %v6464_v52, %v7366_v24  ;;  %v6191_v24 = vrot.slane %v8358_v61, %v3216_v53 }
0x128a   :  { %v6087_v39 = vpop.xlane.xlu1 %6086 }
0x128b   :  { %7144 = vrsqrt.f32 %v6094_v35  ;;  %v6091_v40 = vmul.f32 0.03125, %v6087_v39 }
0x128d   :  { %v6093_v20 = vadd.f32 1e-05, %v6091_v40 }
0x128e   :  { %v6143_v42 = vpop.permute.xlu1 %6142 }
0x128f   :  { %7146 = vrsqrt.f32 %v6093_v20 }
0x1295   :  { %v7145_v8 = vpop.eup %7144 }
0x1296   :  { %v6098_v33 = vmul.f32 %v7145_v8, %v6082_v46  ;;  %v3445_v46 = vld [vmem:[%s8457_s3 + $0x138] sm:$0xff] }
0x1298   :  { %v6104_v27 = vmul.f32 %v6102_v38, %v6098_v33 }
0x1299   :  { %v7147_v12 = vpop.eup %7146 }
0x129a   :  { %v6097_v2 = vmul.f32 %v7147_v12, %v6081_v18  ;;  %v6110_v45 = vadd.f32 %v6108_v56, %v6104_v27  ;;  %v7027_v18 = vpack.c.bf16 %v3445_v46, %v3444_v17  ;;  %v6397_v17 = vrot.slane %v6464_v52, %v7851_v30 }
0x129c   :  { %v6103_v5 = vmul.f32 %v6102_v38, %v6097_v2  ;;  %v6149_v6 = vadd.f32 %v6145_v16, %v6110_v45  ;;  %7028 = vmatprep.subr.bf16.mxu0 %v7027_v18 }
0x129d   :  { %7030 = vmatpush3.bf16.msra.mxu0 %v7027_v18 }
0x129e   :  { %v6109_v0 = vadd.f32 %v6108_v56, %v6103_v5  ;;  %v6153_v1 = vsel %vm382_vm1, %v6149_v6, 0.0  ;;  %7032 = vmatprep.subr.bf16.mxu0 %v7031_v31  ;;  %v3448_v56 = vld [vmem:[%s8457_s3 + $0x150] sm:$0xff] }
0x129f   :  { %6154 = vadd.xlane.f32.xlu1 %v6153_v1  ;;  %v7035_v33 = vpack.c.bf16 %v3449_v3, %v3448_v56 }
0x12a0   :  { %v6148_v34 = vadd.f32 %v6143_v42, %v6109_v0 }
0x12a1   :  { %7034 = vmatpush3.bf16.msra.mxu0 %v7031_v31 }
0x12a2   :  { %v6150_v44 = vsel %vm382_vm1, %v6148_v34, 0.0  ;;  %7036 = vmatprep.subr.bf16.mxu0 %v7035_v33 }
0x12a3   :  { %6151 = vadd.xlane.f32.xlu0 %v6150_v44 }
0x12a5   :  { %7038 = vmatpush3.bf16.msra.mxu0 %v7035_v33 }
0x132c   :  { %v6155_v36 = vpop.xlane.xlu1 %6154 }
0x132d   :  { %v6157_v7 = vmul.f32 0.03125, %v6155_v36 }
0x132f   :  { %v6159_v59 = vsub.f32 %v6149_v6, %v6157_v7  ;;  %v6278_v6 = vrot.slane %v8358_v61, %v3303_v10 }
0x1330   :  { %v6152_v37 = vpop.xlane.xlu0 %6151 }
0x1331   :  { %v6156_v58 = vmul.f32 0.03125, %v6152_v37  ;;  %v6161_v19 = vmul.f32 %v6159_v59, %v6159_v59 }
0x1333   :  { %v6158_v14 = vsub.f32 %v6148_v34, %v6156_v58  ;;  %v6165_v54 = vsel %vm382_vm1, %v6161_v19, 0.0 }
0x1335   :  { %v6160_v57 = vmul.f32 %v6158_v14, %v6158_v14 }
0x1337   :  { %v6162_v21 = vsel %vm382_vm1, %v6160_v57, 0.0 }
0x1338   :  { %6163 = vadd.xlane.f32.xlu0 %v6162_v21 }
0x133c   :  { %6166 = vadd.xlane.f32.xlu0 %v6165_v54 }
0x13c5   :  { %v6164_v55 = vpop.xlane.xlu0 %6163 }
0x13c6   :  { %v6168_v41 = vmul.f32 0.03125, %v6164_v55 }
0x13c8   :  { %v6170_v9 = vadd.f32 1e-05, %v6168_v41 }
0x13c9   :  { %v6167_v50 = vpop.xlane.xlu0 %6166 }
0x13ca   :  { %7148 = vrsqrt.f32 %v6170_v9  ;;  %v6169_v15 = vmul.f32 0.03125, %v6167_v50 }
0x13cc   :  { %v6171_v25 = vadd.f32 1e-05, %v6169_v15 }
0x13ce   :  { %7150 = vrsqrt.f32 %v6171_v25 }
0x13d4   :  { %v7149_v22 = vpop.eup %7148 }
0x13d5   :  { %v6174_v51 = vmul.f32 %v7149_v22, %v6158_v14 }
0x13d7   :  { %v6180_v35 = vmul.f32 %v6179_v60, %v6174_v51 }
0x13d8   :  { %v7151_v39 = vpop.eup %7150 }
0x13d9   :  { %v6175_v40 = vmul.f32 %v7151_v39, %v6159_v59  ;;  %v6186_v20 = vadd.f32 %v6185_v4, %v6180_v35 }
0x13db   :  { %v6181_v38 = vmul.f32 %v6179_v60, %v6175_v40  ;;  %6899 = vmatprep.mubr.msk.f32.mxu1 %vm382_vm1, %v6186_v20 }
0x13dd   :  { %v6187_v8 = vadd.f32 %v6185_v4, %v6181_v38 }
0x13df   :  { %6900 = vmatmul.mubr.msk.f32.vlgmr.msra.gmra.mrb[56].mxu1 %vm382_vm1, %v6187_v8 }
0x14b2   :  { %v6901_v27 = vpop.f32.mrb[56].mxu1 }
0x14b3   :  { %v6270_v12 = vadd.f32 %v6901_v27, %v6191_v24  ;;  %v6264_v2 = vpop.f32.mrb[57].mxu1 }
0x14b4   :  { %v6265_v45 = vadd.f32 %v6264_v2, %v6191_v24 }
0x14b5   :  { %v6274_v5 = vmax.f32 %v6270_v12, 0.0 }
0x14b6   :  { %v6273_v16 = vmax.f32 %v6265_v45, 0.0 }
0x14b8   :  { %6918 = vmatprep.mubr.msk.f32.mxu0 %vm3305_vm5, %v6273_v16 }
0x14b9   :  { %6919 = vmatmul.mubr.msk.f32.vlgmr.msra.gmra.mrb[24].mxu0 %vm3305_vm5, %v6274_v5 }
0x158c   :  { %v6920_v0 = vpop.f32.mrb[24].mxu0 }
0x158d   :  { %v6357_v1 = vadd.f32 %v6920_v0, %v6278_v6  ;;  %v6351_v42 = vpop.f32.mrb[25].mxu0 }
0x158e   :  { %v6352_v34 = vadd.f32 %v6351_v42, %v6278_v6 }
0x158f   :  { %v6361_v44 = vadd.f32 %v6357_v1, %v6187_v8 }
0x1590   :  { %v6360_v53 = vadd.f32 %v6352_v34, %v6186_v20 }
0x1591   :  { %v6365_v36 = vsel %vm382_vm1, %v6361_v44, 0.0 }
0x1592   :  { %6366 = vadd.xlane.f32.xlu1 %v6365_v36  ;;  %v6362_v7 = vsel %vm382_vm1, %v6360_v53, 0.0 }
0x1593   :  { %6363 = vadd.xlane.f32.xlu0 %v6362_v7 }
0x161f   :  { %v6367_v37 = vpop.xlane.xlu1 %6366 }
0x1620   :  { %v6369_v58 = vmul.f32 0.03125, %v6367_v37  ;;  %v6364_v59 = vpop.xlane.xlu0 %6363 }
0x1621   :  { %v6368_v14 = vmul.f32 0.03125, %v6364_v59 }
0x1622   :  { %v6371_v57 = vsub.f32 %v6361_v44, %v6369_v58 }
0x1623   :  { %v6370_v11 = vsub.f32 %v6360_v53, %v6368_v14 }
0x1624   :  { %v6373_v21 = vmul.f32 %v6371_v57, %v6371_v57 }
0x1625   :  { %v6372_v10 = vmul.f32 %v6370_v11, %v6370_v11 }
0x1626   :  { %v6377_v61 = vsel %vm382_vm1, %v6373_v21, 0.0 }
0x1627   :  { %6378 = vadd.xlane.f32.xlu1 %v6377_v61  ;;  %v6374_v19 = vsel %vm382_vm1, %v6372_v10, 0.0 }
0x1628   :  { %6375 = vadd.xlane.f32.xlu0 %v6374_v19 }
0x16b4   :  { %v6379_v54 = vpop.xlane.xlu1 %6378 }
0x16b5   :  { %v6381_v63 = vmul.f32 0.03125, %v6379_v54  ;;  %v6376_v26 = vpop.xlane.xlu0 %6375 }
0x16b6   :  { %v6380_v13 = vmul.f32 0.03125, %v6376_v26 }
0x16b7   :  { %v6383_v28 = vadd.f32 1e-05, %v6381_v63 }
0x16b8   :  { %v6382_v43 = vadd.f32 1e-05, %v6380_v13 }
0x16b9   :  { %7152 = vrsqrt.f32 %v6383_v28 }
0x16ba   :  { %7154 = vrsqrt.f32 %v6382_v43 }
0x16c3   :  { %v7153_v49 = vpop.eup %7152 }
0x16c4   :  { %v7155_v23 = vpop.eup %7154  ;;  %v6387_v62 = vmul.f32 %v7153_v49, %v6371_v57 }
0x16c5   :  { %v6386_v46 = vmul.f32 %v7155_v23, %v6370_v11 }
0x16c6   :  { %v6393_v18 = vmul.f32 %v6391_v48, %v6387_v62 }
0x16c7   :  { %v6392_v32 = vmul.f32 %v6391_v48, %v6386_v46 }
0x16c8   :  { %v6399_v29 = vadd.f32 %v6397_v17, %v6393_v18 }
0x16c9   :  { %v6398_v31 = vadd.f32 %v6397_v17, %v6392_v32 }
0x16ca   :  { %6401 = vst.msk [vmem:[%s8460_s5 + $0x8] sm:$0xff] %vm382_vm1, %v6399_v29 }
0x16cb   :  { %6400 = vst.msk [vmem:[%s8460_s5] sm:$0xff] %vm382_vm1, %v6398_v31 }

</bundles_post_ra>
